<compile_context>
chip_gen: v7x
topology: tpu7x:2x2x1
jax: 0.10.0
libtpu: 0.0.40
codegen_flags: <defaults>
</compile_context>

<pallas_src>
import functools
import math

import jax
import jax.numpy as jnp
from jax import lax
from jax.experimental import pallas as pl
from jax.experimental.pallas import tpu as pltpu

_LANE = 128                       # lane (last-dim) tile multiple
_SUB = 16                         # sublane tile multiple (bf16-safe)
_VMEM_LIMIT = 48 * 1024 * 1024    # raise scoped VMEM (v5e default is 16 MiB)


def _cparams(*semantics):
    return pltpu.CompilerParams(dimension_semantics=semantics,
                                vmem_limit_bytes=_VMEM_LIMIT)


# ----------------------------- tiling helpers --------------------------------

def _round_up(x, m):
    return ((x + m - 1) // m) * m


def _pick_tile(dim, preferred, mult):
    """Return (tile, padded_dim).

    tile is either the full dim (always a legal block) or a multiple of
    `mult` (128 for lane dims, 16 for sublane dims) dividing padded_dim.
    When no aligned divisor exists (e.g. vocab=21128) the dim is padded up so
    stores stay lane-dense / unmasked instead of falling back to tiny tiles.
    """
    if dim <= preferred:
        return dim, dim
    pref = max((preferred // mult) * mult, mult)
    for t in range(pref, mult - 1, -mult):
        if dim % t == 0:
            return t, dim
    dim_p = _round_up(dim, 2 * mult)          # e.g. 21128 -> 21248
    for t in range(pref, mult - 1, -mult):
        if dim_p % t == 0:
            return t, dim_p
    return 2 * mult, dim_p


def _pad_dim(a, axis, new):
    if a.shape[axis] == new:
        return a
    pad = [(0, 0)] * a.ndim
    pad[axis] = (0, new - a.shape[axis])
    return jnp.pad(a, pad)


def _apply_act(y, act):
    if act == "relu":
        return jnp.maximum(y, 0.0)
    if act == "tanh":
        return jnp.tanh(y)
    if act == "gelu":
        # TODO(synk): HF BERT uses erf-GELU; tanh approximation used here.
        return jax.nn.gelu(y, approximate=True)
    return y


# ------------------- tiled matmul + bias + activation ------------------------

def _linear_kernel(x_ref, w_ref, b_ref, o_ref, acc_ref, *, act):
    @pl.when(pl.program_id(2) == 0)
    def _():
        acc_ref[...] = jnp.zeros_like(acc_ref)

    acc_ref[...] += jnp.dot(x_ref[...], w_ref[...],
                            preferred_element_type=jnp.float32)

    @pl.when(pl.program_id(2) == pl.num_programs(2) - 1)
    def _():
        y = acc_ref[...] + b_ref[...].astype(jnp.float32)
        y = _apply_act(y, act)
        o_ref[...] = y.astype(o_ref.dtype)


def linear(x, w, b, act="none", out_dtype=jnp.bfloat16,
           tm=512, tn=1024, tk=1024):
    """(M,K) @ (K,N) + b, fused activation, f32 accumulation, tiled grid.

    Lane dims (tn, tk) are kept multiples of 128 (padding N/K when needed,
    e.g. vocab 21128 -> 21248) so output stores are lane-dense and MXU tiles
    full; K is taken whole per grid step whenever it fits (fewer accumulator
    passes / per-step overheads).
    """
    M, K = x.shape
    N = w.shape[1]
    tm, Mp = _pick_tile(M, tm, _SUB)
    tn, Np = _pick_tile(N, tn, _LANE)
    tk, Kp = _pick_tile(K, tk, _LANE)
    # TODO(synk): at production sizes pre-pad the vocab-projection weight once
    # at init instead of re-padding it inside every jitted forward.
    x = _pad_dim(_pad_dim(x, 0, Mp), 1, Kp)
    w = _pad_dim(_pad_dim(w, 0, Kp), 1, Np)
    b2 = _pad_dim(b.reshape(1, N), 1, Np)

    grid = (Mp // tm, Np // tn, Kp // tk)
    out = pl.pallas_call(
        functools.partial(_linear_kernel, act=act),
        out_shape=jax.ShapeDtypeStruct((Mp, Np), out_dtype),
        grid=grid,
        in_specs=[
            pl.BlockSpec((tm, tk), lambda i, j, k: (i, k)),
            # NOTE(v5e): if the weight DMA shows up exposed in profiles, sweep
            # pipeline_mode=pl.Buffered(3) on this spec.
            pl.BlockSpec((tk, tn), lambda i, j, k: (k, j)),
            pl.BlockSpec((1, tn), lambda i, j, k: (0, j)),
        ],
        out_specs=pl.BlockSpec((tm, tn), lambda i, j, k: (i, j)),
        scratch_shapes=[pltpu.VMEM((tm, tn), jnp.float32)],
        compiler_params=_cparams("parallel", "parallel", "arbitrary"),
    )(x, w, b2)
    if (Mp, Np) != (M, N):
        out = out[:M, :N]
    return out


# ------- tiled matmul + bias (+ residual) (+ act) + layernorm epilogue -------

def _linear_ln_kernel(*refs, act, has_res, eps):
    if has_res:
        x_ref, w_ref, b_ref, r_ref, g_ref, be_ref, o_ref, acc_ref = refs
    else:
        x_ref, w_ref, b_ref, g_ref, be_ref, o_ref, acc_ref = refs
        r_ref = None
    k = pl.program_id(1)

    @pl.when(k == 0)
    def _():
        acc_ref[...] = jnp.zeros_like(acc_ref)

    acc_ref[...] += jnp.dot(x_ref[...], w_ref[...],
                            preferred_element_type=jnp.float32)

    @pl.when(k == pl.num_programs(1) - 1)
    def _():
        y = acc_ref[...] + b_ref[...].astype(jnp.float32)
        if r_ref is not None:
            y = y + r_ref[...].astype(jnp.float32)
        y = _apply_act(y, act)
        mu = jnp.mean(y, axis=-1, keepdims=True)
        var = jnp.mean(jnp.square(y - mu), axis=-1, keepdims=True)
        yn = (y - mu) * lax.rsqrt(var + eps)
        o_ref[...] = (yn * g_ref[...].astype(jnp.float32)
                      + be_ref[...].astype(jnp.float32)).astype(o_ref.dtype)


def linear_ln(x, w, b, gamma, beta, residual=None, act="none",
              out_dtype=jnp.bfloat16, eps=1e-12, tm=512, tk=1024):
    """Fused (x @ w + b [+ residual]) -> act -> layernorm.

    Full-N tiles so the LN row statistics come from a single block.  Only
    used for N ~= hidden; the tm cap below keeps the (tm, N) f32 accumulator
    within v7x's smaller scoped-VMEM budget (do NOT reuse for N=inter/vocab).
    """
    M, K = x.shape
    N = w.shape[1]
    while tm > 64 and tm * N * 4 > (8 << 20):   # v7x guard on the f32 acc
        tm //= 2
    tm, Mp = _pick_tile(M, tm, _SUB)
    tk, Kp = _pick_tile(K, tk, _LANE)
    x = _pad_dim(_pad_dim(x, 0, Mp), 1, Kp)
    w = _pad_dim(w, 0, Kp)
    has_res = residual is not None
    if has_res:
        residual = _pad_dim(residual, 0, Mp)

    grid = (Mp // tm, Kp // tk)
    in_specs = [
        pl.BlockSpec((tm, tk), lambda i, k: (i, k)),
        pl.BlockSpec((tk, N), lambda i, k: (k, 0)),
        pl.BlockSpec((1, N), lambda i, k: (0, 0)),
    ]
    args = [x, w, b.reshape(1, N)]
    if has_res:
        in_specs.append(pl.BlockSpec((tm, N), lambda i, k: (i, 0)))
        args.append(residual)
    in_specs += [pl.BlockSpec((1, N), lambda i, k: (0, 0)),
                 pl.BlockSpec((1, N), lambda i, k: (0, 0))]
    args += [gamma.reshape(1, N), beta.reshape(1, N)]

    out = pl.pallas_call(
        functools.partial(_linear_ln_kernel, act=act, has_res=has_res, eps=eps),
        out_shape=jax.ShapeDtypeStruct((Mp, N), out_dtype),
        grid=grid,
        in_specs=in_specs,
        out_specs=pl.BlockSpec((tm, N), lambda i, k: (i, 0)),
        scratch_shapes=[pltpu.VMEM((tm, N), jnp.float32)],
        compiler_params=_cparams("parallel", "arbitrary"),
    )(*args)
    if Mp != M:
        out = out[:M]
    return out


# --------------- fused embedding-sum + layernorm (no f32 in HBM) -------------

def _embed_ln_kernel(w_ref, t_ref, p_ref, g_ref, b_ref, o_ref, *, eps):
    x = (w_ref[...].astype(jnp.float32) + t_ref[...].astype(jnp.float32)
         + p_ref[...].astype(jnp.float32))
    mu = jnp.mean(x, axis=-1, keepdims=True)
    var = jnp.mean(jnp.square(x - mu), axis=-1, keepdims=True)
    y = (x - mu) * lax.rsqrt(var + eps)
    o_ref[...] = (y * g_ref[...] + b_ref[...]).astype(o_ref.dtype)


def embed_layernorm(word_e, type_e, pos_e, gamma, beta, *, batch, seq,
                    eps=1e-12, out_dtype=jnp.bfloat16):
    """word+type+pos embedding sum fused into the LN kernel: the three bf16
    operands are summed/upcast in VMEM, so the f32 sum never hits HBM."""
    M, H = word_e.shape            # M = batch * seq
    return pl.pallas_call(
        functools.partial(_embed_ln_kernel, eps=eps),
        out_shape=jax.ShapeDtypeStruct((M, H), out_dtype),
        grid=(batch,),
        in_specs=[pl.BlockSpec((seq, H), lambda b: (b, 0)),
                  pl.BlockSpec((seq, H), lambda b: (b, 0)),
                  pl.BlockSpec((seq, H), lambda b: (0, 0)),
                  pl.BlockSpec((1, H), lambda b: (0, 0)),
                  pl.BlockSpec((1, H), lambda b: (0, 0))],
        out_specs=pl.BlockSpec((seq, H), lambda b: (b, 0)),
        compiler_params=_cparams("parallel"),
    )(word_e, type_e, pos_e, gamma.reshape(1, H), beta.reshape(1, H))


# ------------------------- multi-head self attention -------------------------

def _attn_kernel(qkv_ref, mask_ref, o_ref, ctx_ref, *, heads, scale):
    S, H3 = qkv_ref.shape
    H = H3 // 3
    Dh = H // heads
    qkv = qkv_ref[...]                                 # (S, 3H) bf16
    mask = mask_ref[...].astype(jnp.float32)           # (1, S) additive
    for h in range(heads):                             # static lane slices
        # scale folded into q (S,Dh) -- not the (S,S) score matrix
        qh = qkv[:, h * Dh:(h + 1) * Dh] * scale
        kh = qkv[:, H + h * Dh:H + (h + 1) * Dh]
        vh = qkv[:, 2 * H + h * Dh:2 * H + (h + 1) * Dh]
        s = lax.dot_general(qh, kh, (((1,), (1,)), ((), ())),
                            preferred_element_type=jnp.float32)
        s = s + mask
        p = jnp.exp(s - jnp.max(s, axis=-1, keepdims=True))
        # TODO(synk): on v6e/v7x the exp could run in bf16 (values <= 0); kept
        # f32 so the same kernel stays safe on v5e (no bf16 EUP).
        recip = pl.reciprocal(jnp.sum(p, axis=-1, keepdims=True), approx=True)
        ctx = jnp.dot(p.astype(vh.dtype), vh,
                      preferred_element_type=jnp.float32)
        # normalize the (S,Dh) context (not the (S,S) probs) and spill this
        # head's result into the VMEM slab to bound vreg live ranges.
        ctx_ref[:, h * Dh:(h + 1) * Dh] = ctx * recip
    # single lane-dense bf16 store of all heads
    o_ref[...] = ctx_ref[...].astype(o_ref.dtype)


def mha_attention(qkv, add_mask, *, heads, seq):
    """qkv: (B*S, 3H) bf16 (fused projection); add_mask: (B,1,S) additive."""
    M, H3 = qkv.shape
    B = M // seq
    H = H3 // 3
    scale = 1.0 / math.sqrt(H // heads)
    # TODO(synk): for v7x (2 TCs) add a second parallel grid axis (query-block
    # or head-group tiling) once H // groups is a multiple of 128; that needs
    # separate q/k/v BlockSpecs to keep every block lane-dense.
    return pl.pallas_call(
        functools.partial(_attn_kernel, heads=heads, scale=scale),
        out_shape=jax.ShapeDtypeStruct((M, H), jnp.bfloat16),
        grid=(B,),
        in_specs=[pl.BlockSpec((seq, H3), lambda b: (b, 0)),
                  pl.BlockSpec((None, 1, seq), lambda b: (b, 0, 0))],
        out_specs=pl.BlockSpec((seq, H), lambda b: (b, 0)),
        scratch_shapes=[pltpu.VMEM((seq, H), jnp.float32)],
        compiler_params=_cparams("parallel"),
    )(qkv, add_mask)


# ----------------------- fused pooler + NSP head kernel ----------------------

def _pooler_nsp_kernel(cls_ref, pw_ref, pb_ref, w1_ref, b1_ref, w2_ref, b2_ref,
                       pooled_ref, nsp_ref):
    cls = cls_ref[...]
    pooled = jnp.tanh(jnp.dot(cls, pw_ref[...],
                              preferred_element_type=jnp.float32)
                      + pb_ref[...].astype(jnp.float32))
    pooled_ref[...] = pooled.astype(pooled_ref.dtype)
    h = jnp.tanh(jnp.dot(pooled.astype(w1_ref.dtype), w1_ref[...],
                         preferred_element_type=jnp.float32)
                 + b1_ref[...].astype(jnp.float32))
    nsp = (jnp.dot(h.astype(w2_ref.dtype), w2_ref[...],
                   preferred_element_type=jnp.float32)
           + b2_ref[...].astype(jnp.float32))
    nsp_ref[...] = nsp.astype(nsp_ref.dtype)


def pooler_nsp(cls, pw, pb, w1, b1, w2, b2):
    B, H = cls.shape
    return pl.pallas_call(
        _pooler_nsp_kernel,
        out_shape=(jax.ShapeDtypeStruct((B, H), jnp.float32),
                   jax.ShapeDtypeStruct((B, 2), jnp.float32)),
        grid=(1,),
        in_specs=[pl.BlockSpec((B, H), lambda i: (0, 0)),
                  pl.BlockSpec((H, H), lambda i: (0, 0)),
                  pl.BlockSpec((1, H), lambda i: (0, 0)),
                  pl.BlockSpec((H, H), lambda i: (0, 0)),
                  pl.BlockSpec((1, H), lambda i: (0, 0)),
                  pl.BlockSpec((H, 2), lambda i: (0, 0)),
                  pl.BlockSpec((1, 2), lambda i: (0, 0))],
        out_specs=(pl.BlockSpec((B, H), lambda i: (0, 0)),
                   pl.BlockSpec((B, 2), lambda i: (0, 0))),
        compiler_params=_cparams("arbitrary"),
    )(cls, pw, pb.reshape(1, H), w1, b1.reshape(1, H), w2, b2.reshape(1, 2))


# --------------------------- parameters (synthetic) ---------------------------

class _KeyGen:
    def __init__(self, key):
        self.key = key

    def __call__(self):
        self.key, sub = jax.random.split(self.key)
        return sub


def init_params(key, *, vocab, hidden, inter, layers, heads, max_pos,
                type_vocab=2):
    kg = _KeyGen(key)

    def w(shape):  # bf16 weights (MXU-native); f32 biases / LN params
        return (0.02 * jax.random.normal(kg(), shape, jnp.float32)
                ).astype(jnp.bfloat16)

    def zeros(n):
        return jnp.zeros((n,), jnp.float32)

    def ones(n):
        return jnp.ones((n,), jnp.float32)

    p = {
        "word_emb": w((vocab, hidden)),
        "pos_emb": w((max_pos, hidden)),
        "type_emb": w((type_vocab, hidden)),
        "emb_ln_g": ones(hidden), "emb_ln_b": zeros(hidden),
        "pool_w": w((hidden, hidden)), "pool_b": zeros(hidden),
        # MaskLM head: Linear -> ReLU -> LayerNorm -> Linear(vocab)
        "mlm_w1": w((hidden, hidden)), "mlm_b1": zeros(hidden),
        "mlm_ln_g": ones(hidden), "mlm_ln_b": zeros(hidden),
        "mlm_w2": w((hidden, vocab)), "mlm_b2": zeros(vocab),
        # NextSentencePred head: Linear -> Tanh -> Linear(2)
        "nsp_w1": w((hidden, hidden)), "nsp_b1": zeros(hidden),
        "nsp_w2": w((hidden, 2)), "nsp_b2": zeros(2),
        "layers": [],
    }
    for _ in range(layers):
        p["layers"].append({
            "w_qkv": w((hidden, 3 * hidden)), "b_qkv": zeros(3 * hidden),
            "wo": w((hidden, hidden)), "bo": zeros(hidden),
            "ln1_g": ones(hidden), "ln1_b": zeros(hidden),
            "w1": w((hidden, inter)), "b1": zeros(inter),
            "w2": w((inter, hidden)), "b2": zeros(hidden),
            "ln2_g": ones(hidden), "ln2_b": zeros(hidden),
        })
    return p


# ------------------------------- forward pass ---------------------------------

def bert_encoder(params, input_ids, attention_mask, token_type_ids, *, heads):
    B, S = input_ids.shape
    H = params["word_emb"].shape[1]

    # Data-dependent gathers stay plain-JAX; the sum + layernorm is fused in
    # one kernel over the bf16 operands (no f32 intermediate in HBM).
    word_e = params["word_emb"][input_ids].reshape(B * S, H)
    type_e = params["type_emb"][token_type_ids].reshape(B * S, H)
    pos_e = params["pos_emb"][:S]
    x2 = embed_layernorm(word_e, type_e, pos_e,
                         params["emb_ln_g"], params["emb_ln_b"],
                         batch=B, seq=S)

    add_mask = (1.0 - attention_mask.astype(jnp.float32))[:, None, :] * -1e9

    for lp in params["layers"]:
        qkv = linear(x2, lp["w_qkv"], lp["b_qkv"])               # (B*S, 3H)
        ctx = mha_attention(qkv, add_mask, heads=heads, seq=S)   # (B*S, H)
        x2 = linear_ln(ctx, lp["wo"], lp["bo"], lp["ln1_g"], lp["ln1_b"],
                       residual=x2)
        h = linear(x2, lp["w1"], lp["b1"], act="gelu")
        x2 = linear_ln(h, lp["w2"], lp["b2"], lp["ln2_g"], lp["ln2_b"],
                       residual=x2)

    last_hidden = x2.reshape(B, S, H)                            # bf16
    cls = last_hidden[:, 0, :]                                   # (B, H)
    pooled, nsp = pooler_nsp(cls, params["pool_w"], params["pool_b"],
                             params["nsp_w1"], params["nsp_b1"],
                             params["nsp_w2"], params["nsp_b2"])
    return last_hidden, pooled, nsp


def mlm_head(params, X, pred_positions, logits_dtype=jnp.bfloat16):
    # X: (B, S, H) bf16, pred_positions: (B, P). Gather is plain-JAX glue.
    B, S, H = X.shape
    P = pred_positions.shape[1]
    idx = jnp.broadcast_to(pred_positions[:, :, None], (B, P, H))
    masked_X = jnp.take_along_axis(X, idx, axis=1).reshape(B * P, H)
    h = linear_ln(masked_X, params["mlm_w1"], params["mlm_b1"],
                  params["mlm_ln_g"], params["mlm_ln_b"], act="relu")
    # bf16 logits halve the widest store in the model; upcast in the loss.
    y = linear(h, params["mlm_w2"], params["mlm_b2"], out_dtype=logits_dtype)
    return y.reshape(B, P, -1)


def torch_bert_forward(params, input_ids, attention_mask, token_type_ids,
                       padded_pred_positions, *, heads):
    last_hidden, pooled, nsp_Y_hat = bert_encoder(
        params, input_ids, attention_mask, token_type_ids, heads=heads)
    output = {"last_hidden_state": last_hidden.astype(jnp.float32),
              "pooler_output": pooled}
    mlm_Y_hat = mlm_head(params, last_hidden, padded_pred_positions)
    return output, mlm_Y_hat, nsp_Y_hat


# ------------------------------------ main ------------------------------------

if __name__ == "__main__":
    # Small, structurally-faithful config (real model: vocab=21128, hidden=768,
    # 12 layers, 12 heads).  VOCAB=1160 is chosen to be "awkward" like 21128
    # (== 8 mod 128) so the vocab-projection padding path (1160 -> 1280,
    # lane-dense tn) is exercised at demo scale.
    VOCAB, HIDDEN, INTER, LAYERS, HEADS = 1160, 64, 128, 2, 2
    B, S, P, MAX_POS = 2, 8, 4, 16

    key = jax.random.PRNGKey(0)
    k_param, k_ids, k_type, k_pred = jax.random.split(key, 4)

    params = init_params(k_param, vocab=VOCAB, hidden=HIDDEN, inter=INTER,
                         layers=LAYERS, heads=HEADS, max_pos=MAX_POS)

    input_ids = jax.random.randint(k_ids, (B, S), 0, VOCAB, dtype=jnp.int32)
    attention_mask = jnp.ones((B, S), jnp.int32).at[1, -2:].set(0)
    token_type_ids = jnp.concatenate(
        [jnp.zeros((B, S // 2), jnp.int32), jnp.ones((B, S // 2), jnp.int32)],
        axis=1)
    padded_pred_positions = jax.random.randint(k_pred, (B, P), 0, S,
                                               dtype=jnp.int32)

    fwd = jax.jit(functools.partial(torch_bert_forward, heads=HEADS))
    output, mlm_Y_hat, nsp_Y_hat = fwd(params, input_ids, attention_mask,
                                       token_type_ids, padded_pred_positions)

    jax.block_until_ready((output, mlm_Y_hat, nsp_Y_hat))
    assert output["last_hidden_state"].shape == (B, S, HIDDEN)
    assert output["pooler_output"].shape == (B, HIDDEN)
    assert mlm_Y_hat.shape == (B, P, VOCAB)
    assert nsp_Y_hat.shape == (B, 2)
    assert bool(jnp.isfinite(output["last_hidden_state"]).all())
    assert bool(jnp.isfinite(mlm_Y_hat.astype(jnp.float32)).all())
    assert bool(jnp.isfinite(nsp_Y_hat).all())
    print("KERNEL_OK")
</pallas_src>

<mosaic_0001>
module attributes {stable_mosaic.version = 11 : i64} {
  func.func @_embed_ln_kernel(%arg0: i32, %arg1: memref<8x64xbf16, #tpu.memory_space<vmem>>, %arg2: memref<8x64xbf16, #tpu.memory_space<vmem>>, %arg3: memref<8x64xbf16, #tpu.memory_space<vmem>>, %arg4: memref<1x64xf32, #tpu.memory_space<vmem>>, %arg5: memref<1x64xf32, #tpu.memory_space<vmem>>, %arg6: memref<8x64xbf16, #tpu.memory_space<vmem>>) attributes {dimension_semantics = [#tpu.dimension_semantics<parallel>], iteration_bounds = array<i64: 2>, scalar_prefetch = 0 : i64, scratch_operands = 0 : i64, tpu.core_type = #tpu.core_type<tc>, window_params = [{transform_indices = @transform_0, window_bounds = array<i64: 8, 64>}, {transform_indices = @transform_1, window_bounds = array<i64: 8, 64>}, {pipeline_mode = #tpu.pipeline_mode<synchronous>, transform_indices = @transform_2, window_bounds = array<i64: 8, 64>}, {pipeline_mode = #tpu.pipeline_mode<synchronous>, transform_indices = @transform_3, window_bounds = array<i64: 1, 64>}, {pipeline_mode = #tpu.pipeline_mode<synchronous>, transform_indices = @transform_4, window_bounds = array<i64: 1, 64>}, {transform_indices = @transform_5, window_bounds = array<i64: 8, 64>}]} {
    %c0 = arith.constant 0 : index
    %c0_0 = arith.constant 0 : index
    %0 = vector.load %arg1[%c0, %c0_0] : memref<8x64xbf16, #tpu.memory_space<vmem>>, vector<8x64xbf16>
    %1 = arith.extf %0 : vector<8x64xbf16> to vector<8x64xf32>
    %c0_1 = arith.constant 0 : index
    %c0_2 = arith.constant 0 : index
    %2 = vector.load %arg2[%c0_1, %c0_2] : memref<8x64xbf16, #tpu.memory_space<vmem>>, vector<8x64xbf16>
    %3 = arith.extf %2 : vector<8x64xbf16> to vector<8x64xf32>
    %4 = arith.addf %1, %3 : vector<8x64xf32>
    %c0_3 = arith.constant 0 : index
    %c0_4 = arith.constant 0 : index
    %5 = vector.load %arg3[%c0_3, %c0_4] : memref<8x64xbf16, #tpu.memory_space<vmem>>, vector<8x64xbf16>
    %6 = arith.extf %5 : vector<8x64xbf16> to vector<8x64xf32>
    %7 = arith.addf %4, %6 : vector<8x64xf32>
    %cst = arith.constant dense<0.000000e+00> : vector<8xf32>
    %8 = vector.multi_reduction <add>, %7, %cst [1] : vector<8x64xf32> to vector<8xf32>
    %9 = vector.shape_cast %8 : vector<8xf32> to vector<8x1xf32>
    %cst_5 = arith.constant 6.400000e+01 : f32
    %10 = vector.broadcast %cst_5 : f32 to vector<8x1xf32>
    %11 = arith.divf %9, %10 : vector<8x1xf32>
    %12 = vector.broadcast %11 : vector<8x1xf32> to vector<8x64xf32>
    %13 = arith.subf %7, %12 : vector<8x64xf32>
    %14 = arith.mulf %13, %13 : vector<8x64xf32>
    %cst_6 = arith.constant dense<0.000000e+00> : vector<8xf32>
    %15 = vector.multi_reduction <add>, %14, %cst_6 [1] : vector<8x64xf32> to vector<8xf32>
    %16 = vector.shape_cast %15 : vector<8xf32> to vector<8x1xf32>
    %cst_7 = arith.constant 6.400000e+01 : f32
    %17 = vector.broadcast %cst_7 : f32 to vector<8x1xf32>
    %18 = arith.divf %16, %17 : vector<8x1xf32>
    %19 = vector.broadcast %11 : vector<8x1xf32> to vector<8x64xf32>
    %20 = arith.subf %7, %19 : vector<8x64xf32>
    %cst_8 = arith.constant 9.99999996E-13 : f32
    %21 = vector.broadcast %cst_8 : f32 to vector<8x1xf32>
    %22 = arith.addf %18, %21 : vector<8x1xf32>
    %23 = math.rsqrt %22 : vector<8x1xf32>
    %24 = vector.broadcast %23 : vector<8x1xf32> to vector<8x64xf32>
    %25 = arith.mulf %20, %24 : vector<8x64xf32>
    %c0_9 = arith.constant 0 : index
    %c0_10 = arith.constant 0 : index
    %26 = vector.load %arg4[%c0_9, %c0_10] : memref<1x64xf32, #tpu.memory_space<vmem>>, vector<1x64xf32>
    %27 = vector.broadcast %26 : vector<1x64xf32> to vector<8x64xf32>
    %28 = arith.mulf %25, %27 : vector<8x64xf32>
    %c0_11 = arith.constant 0 : index
    %c0_12 = arith.constant 0 : index
    %29 = vector.load %arg5[%c0_11, %c0_12] : memref<1x64xf32, #tpu.memory_space<vmem>>, vector<1x64xf32>
    %30 = vector.broadcast %29 : vector<1x64xf32> to vector<8x64xf32>
    %31 = arith.addf %28, %30 : vector<8x64xf32>
    %32 = arith.truncf %31 : vector<8x64xf32> to vector<8x64xbf16>
    %c0_13 = arith.constant 0 : index
    %c0_14 = arith.constant 0 : index
    %33 = vector.load %arg6[%c0_13, %c0_14] : memref<8x64xbf16, #tpu.memory_space<vmem>>, vector<8x64xbf16>
    tpu.vector_store %arg6[%c0_13, %c0_14], %32 {strides = array<i32>} : memref<8x64xbf16, #tpu.memory_space<vmem>>, vector<8x64xbf16>,
    return
  }
  func.func @transform_0(%arg0: i32) -> (i32, i32) {
    %c0_i32 = arith.constant 0 : i32
    %c0_i32_0 = arith.constant 0 : i32
    return %arg0, %c0_i32 : i32, i32
  }
  func.func @transform_1(%arg0: i32) -> (i32, i32) {
    %c0_i32 = arith.constant 0 : i32
    %c0_i32_0 = arith.constant 0 : i32
    return %arg0, %c0_i32 : i32, i32
  }
  func.func @transform_2(%arg0: i32) -> (i32, i32) {
    %c0_i32 = arith.constant 0 : i32
    %c0_i32_0 = arith.constant 0 : i32
    %c0_i32_1 = arith.constant 0 : i32
    return %c0_i32, %c0_i32_0 : i32, i32
  }
  func.func @transform_3(%arg0: i32) -> (i32, i32) {
    %c0_i32 = arith.constant 0 : i32
    %c0_i32_0 = arith.constant 0 : i32
    %c0_i32_1 = arith.constant 0 : i32
    return %c0_i32, %c0_i32_0 : i32, i32
  }
  func.func @transform_4(%arg0: i32) -> (i32, i32) {
    %c0_i32 = arith.constant 0 : i32
    %c0_i32_0 = arith.constant 0 : i32
    %c0_i32_1 = arith.constant 0 : i32
    return %c0_i32, %c0_i32_0 : i32, i32
  }
  func.func @transform_5(%arg0: i32) -> (i32, i32) {
    %c0_i32 = arith.constant 0 : i32
    %c0_i32_0 = arith.constant 0 : i32
    return %arg0, %c0_i32 : i32, i32
  }
}

module attributes {stable_mosaic.version = 11 : i64} {
  func.func @_linear_kernel(%arg0: i32, %arg1: i32, %arg2: i32, %arg3: memref<16x64xbf16, #tpu.memory_space<vmem>>, %arg4: memref<64x192xbf16, #tpu.memory_space<vmem>>, %arg5: memref<1x192xf32, #tpu.memory_space<vmem>>, %arg6: memref<16x192xbf16, #tpu.memory_space<vmem>>, %arg7: memref<16x192xf32, #tpu.memory_space<vmem>>) attributes {dimension_semantics = [#tpu.dimension_semantics<parallel>, #tpu.dimension_semantics<parallel>, #tpu.dimension_semantics<arbitrary>], iteration_bounds = array<i64: 1, 1, 1>, scalar_prefetch = 0 : i64, scratch_operands = 1 : i64, tpu.core_type = #tpu.core_type<tc>, window_params = [{transform_indices = @transform_0, window_bounds = array<i64: 16, 64>}, {transform_indices = @transform_1, window_bounds = array<i64: 64, 192>}, {transform_indices = @transform_2, window_bounds = array<i64: 1, 192>}, {transform_indices = @transform_3, window_bounds = array<i64: 16, 192>}]} {
    %c0_i32 = arith.constant 0 : i32
    %0 = arith.cmpi eq, %arg2, %c0_i32 : i32
    %1 = arith.extui %0 : i1 to i32
    %c0_i32_0 = arith.constant 0 : i32
    %2 = arith.cmpi ne, %1, %c0_i32_0 : i32
    scf.if %2 {
      %cst_10 = arith.constant 0.000000e+00 : f32
      %12 = vector.broadcast %cst_10 : f32 to vector<16x192xf32>
      %c0_11 = arith.constant 0 : index
      %c0_12 = arith.constant 0 : index
      %13 = vector.load %arg7[%c0_11, %c0_12] : memref<16x192xf32, #tpu.memory_space<vmem>>, vector<16x192xf32>
      tpu.vector_store %arg7[%c0_11, %c0_12], %12 {strides = array<i32>} : memref<16x192xf32, #tpu.memory_space<vmem>>, vector<16x192xf32>,
    } else {
    }
    %c0 = arith.constant 0 : index
    %c0_1 = arith.constant 0 : index
    %3 = vector.load %arg7[%c0, %c0_1] : memref<16x192xf32, #tpu.memory_space<vmem>>, vector<16x192xf32>
    %c0_2 = arith.constant 0 : index
    %c0_3 = arith.constant 0 : index
    %4 = vector.load %arg3[%c0_2, %c0_3] : memref<16x64xbf16, #tpu.memory_space<vmem>>, vector<16x64xbf16>
    %c0_4 = arith.constant 0 : index
    %c0_5 = arith.constant 0 : index
    %5 = vector.load %arg4[%c0_4, %c0_5] : memref<64x192xbf16, #tpu.memory_space<vmem>>, vector<64x192xbf16>
    %cst = arith.constant dense<0.000000e+00> : vector<16x192xf32>
    %6 = tpu.matmul %4, %5, %cst {dimension_numbers = #tpu.dot_dimension_numbers<[1], [0], [0], [1], [0, 0, 1, 1], [], []>} : vector<16x64xbf16>, vector<64x192xbf16>, vector<16x192xf32> -> vector<16x192xf32>
    %7 = arith.addf %3, %6 : vector<16x192xf32>
    %c0_6 = arith.constant 0 : index
    %c0_7 = arith.constant 0 : index
    %8 = vector.load %arg7[%c0_6, %c0_7] : memref<16x192xf32, #tpu.memory_space<vmem>>, vector<16x192xf32>
    tpu.vector_store %arg7[%c0_6, %c0_7], %7 {strides = array<i32>} : memref<16x192xf32, #tpu.memory_space<vmem>>, vector<16x192xf32>,
    %c0_i32_8 = arith.constant 0 : i32
    %9 = arith.cmpi eq, %arg2, %c0_i32_8 : i32
    %10 = arith.extui %9 : i1 to i32
    %c0_i32_9 = arith.constant 0 : i32
    %11 = arith.cmpi ne, %10, %c0_i32_9 : i32
    scf.if %11 {
      %c0_10 = arith.constant 0 : index
      %c0_11 = arith.constant 0 : index
      %12 = vector.load %arg7[%c0_10, %c0_11] : memref<16x192xf32, #tpu.memory_space<vmem>>, vector<16x192xf32>
      %c0_12 = arith.constant 0 : index
      %c0_13 = arith.constant 0 : index
      %13 = vector.load %arg5[%c0_12, %c0_13] : memref<1x192xf32, #tpu.memory_space<vmem>>, vector<1x192xf32>
      %14 = vector.broadcast %13 : vector<1x192xf32> to vector<16x192xf32>
      %15 = arith.addf %12, %14 : vector<16x192xf32>
      %16 = arith.truncf %15 : vector<16x192xf32> to vector<16x192xbf16>
      %c0_14 = arith.constant 0 : index
      %c0_15 = arith.constant 0 : index
      %17 = vector.load %arg6[%c0_14, %c0_15] : memref<16x192xbf16, #tpu.memory_space<vmem>>, vector<16x192xbf16>
      tpu.vector_store %arg6[%c0_14, %c0_15], %16 {strides = array<i32>} : memref<16x192xbf16, #tpu.memory_space<vmem>>, vector<16x192xbf16>,
    } else {
    }
    return
  }
  func.func @transform_0(%arg0: i32, %arg1: i32, %arg2: i32) -> (i32, i32) {
    %c0_i32 = arith.constant 0 : i32
    return %arg0, %arg2 : i32, i32
  }
  func.func @transform_1(%arg0: i32, %arg1: i32, %arg2: i32) -> (i32, i32) {
    %c0_i32 = arith.constant 0 : i32
    return %arg2, %arg1 : i32, i32
  }
  func.func @transform_2(%arg0: i32, %arg1: i32, %arg2: i32) -> (i32, i32) {
    %c0_i32 = arith.constant 0 : i32
    %c0_i32_0 = arith.constant 0 : i32
    return %c0_i32, %arg1 : i32, i32
  }
  func.func @transform_3(%arg0: i32, %arg1: i32, %arg2: i32) -> (i32, i32) {
    %c0_i32 = arith.constant 0 : i32
    return %arg0, %arg1 : i32, i32
  }
}

module attributes {stable_mosaic.version = 11 : i64} {
  func.func @_attn_kernel(%arg0: i32, %arg1: memref<8x192xbf16, #tpu.memory_space<vmem>>, %arg2: memref<1x1x8xf32, #tpu.memory_space<vmem>>, %arg3: memref<8x64xbf16, #tpu.memory_space<vmem>>, %arg4: memref<8x64xf32, #tpu.memory_space<vmem>>) attributes {dimension_semantics = [#tpu.dimension_semantics<parallel>], iteration_bounds = array<i64: 2>, scalar_prefetch = 0 : i64, scratch_operands = 1 : i64, tpu.core_type = #tpu.core_type<tc>, window_params = [{transform_indices = @transform_0, window_bounds = array<i64: 8, 192>}, {transform_indices = @transform_1, window_bounds = array<i64: 1, 1, 8>}, {transform_indices = @transform_2, window_bounds = array<i64: 8, 64>}]} {
    %c0 = arith.constant 0 : index
    %c0_0 = arith.constant 0 : index
    %0 = vector.load %arg1[%c0, %c0_0] : memref<8x192xbf16, #tpu.memory_space<vmem>>, vector<8x192xbf16>
    %c0_1 = arith.constant 0 : index
    %c0_2 = arith.constant 0 : index
    %c0_3 = arith.constant 0 : index
    %1 = vector.load %arg2[%c0_1, %c0_2, %c0_3] : memref<1x1x8xf32, #tpu.memory_space<vmem>>, vector<1x1x8xf32>
    %2 = vector.shape_cast %1 : vector<1x1x8xf32> to vector<1x8xf32>
    %3 = vector.extract_strided_slice %0 {offsets = [0, 0], sizes = [8, 32], strides = [1, 1]} : vector<8x192xbf16> to vector<8x32xbf16>
    %cst = arith.constant 1.767580e-01 : bf16
    %4 = vector.broadcast %cst : bf16 to vector<8x32xbf16>
    %5 = arith.mulf %3, %4 : vector<8x32xbf16>
    %6 = vector.extract_strided_slice %0 {offsets = [0, 64], sizes = [8, 32], strides = [1, 1]} : vector<8x192xbf16> to vector<8x32xbf16>
    %7 = vector.extract_strided_slice %0 {offsets = [0, 128], sizes = [8, 32], strides = [1, 1]} : vector<8x192xbf16> to vector<8x32xbf16>
    %cst_4 = arith.constant dense<0.000000e+00> : vector<8x8xf32>
    %8 = tpu.matmul %5, %6, %cst_4 {dimension_numbers = #tpu.dot_dimension_numbers<[1], [1], [0], [0], [0, 0, 1, 0], [], []>} : vector<8x32xbf16>, vector<8x32xbf16>, vector<8x8xf32> -> vector<8x8xf32>
    %9 = vector.broadcast %2 : vector<1x8xf32> to vector<8x8xf32>
    %10 = arith.addf %8, %9 : vector<8x8xf32>
    %cst_5 = arith.constant dense<0xFF800000> : vector<8xf32>
    %11 = vector.multi_reduction <maximumf>, %10, %cst_5 [1] : vector<8x8xf32> to vector<8xf32>
    %12 = vector.shape_cast %11 : vector<8xf32> to vector<8x1xf32>
    %13 = vector.broadcast %12 : vector<8x1xf32> to vector<8x8xf32>
    %14 = arith.subf %10, %13 : vector<8x8xf32>
    %15 = math.exp %14 : vector<8x8xf32>
    %cst_6 = arith.constant dense<0.000000e+00> : vector<8xf32>
    %16 = vector.multi_reduction <add>, %15, %cst_6 [1] : vector<8x8xf32> to vector<8xf32>
    %17 = vector.shape_cast %16 : vector<8xf32> to vector<8x1xf32>
    %18 = tpu.reciprocal %17 {approx = true} : vector<8x1xf32> -> vector<8x1xf32>
    %19 = arith.truncf %15 : vector<8x8xf32> to vector<8x8xbf16>
    %cst_7 = arith.constant dense<0.000000e+00> : vector<8x32xf32>
    %20 = tpu.matmul %19, %7, %cst_7 {dimension_numbers = #tpu.dot_dimension_numbers<[1], [0], [0], [1], [0, 0, 1, 1], [], []>} : vector<8x8xbf16>, vector<8x32xbf16>, vector<8x32xf32> -> vector<8x32xf32>
    %21 = vector.broadcast %18 : vector<8x1xf32> to vector<8x32xf32>
    %22 = arith.mulf %20, %21 : vector<8x32xf32>
    %c0_8 = arith.constant 0 : index
    %c0_9 = arith.constant 0 : index
    %23 = vector.load %arg4[%c0_8, %c0_9] : memref<8x64xf32, #tpu.memory_space<vmem>>, vector<8x32xf32>
    tpu.vector_store %arg4[%c0_8, %c0_9], %22 {strides = array<i32>} : memref<8x64xf32, #tpu.memory_space<vmem>>, vector<8x32xf32>,
    %24 = vector.extract_strided_slice %0 {offsets = [0, 32], sizes = [8, 32], strides = [1, 1]} : vector<8x192xbf16> to vector<8x32xbf16>
    %cst_10 = arith.constant 1.767580e-01 : bf16
    %25 = vector.broadcast %cst_10 : bf16 to vector<8x32xbf16>
    %26 = arith.mulf %24, %25 : vector<8x32xbf16>
    %27 = vector.extract_strided_slice %0 {offsets = [0, 96], sizes = [8, 32], strides = [1, 1]} : vector<8x192xbf16> to vector<8x32xbf16>
    %28 = vector.extract_strided_slice %0 {offsets = [0, 160], sizes = [8, 32], strides = [1, 1]} : vector<8x192xbf16> to vector<8x32xbf16>
    %cst_11 = arith.constant dense<0.000000e+00> : vector<8x8xf32>
    %29 = tpu.matmul %26, %27, %cst_11 {dimension_numbers = #tpu.dot_dimension_numbers<[1], [1], [0], [0], [0, 0, 1, 0], [], []>} : vector<8x32xbf16>, vector<8x32xbf16>, vector<8x8xf32> -> vector<8x8xf32>
    %30 = vector.broadcast %2 : vector<1x8xf32> to vector<8x8xf32>
    %31 = arith.addf %29, %30 : vector<8x8xf32>
    %cst_12 = arith.constant dense<0xFF800000> : vector<8xf32>
    %32 = vector.multi_reduction <maximumf>, %31, %cst_12 [1] : vector<8x8xf32> to vector<8xf32>
    %33 = vector.shape_cast %32 : vector<8xf32> to vector<8x1xf32>
    %34 = vector.broadcast %33 : vector<8x1xf32> to vector<8x8xf32>
    %35 = arith.subf %31, %34 : vector<8x8xf32>
    %36 = math.exp %35 : vector<8x8xf32>
    %cst_13 = arith.constant dense<0.000000e+00> : vector<8xf32>
    %37 = vector.multi_reduction <add>, %36, %cst_13 [1] : vector<8x8xf32> to vector<8xf32>
    %38 = vector.shape_cast %37 : vector<8xf32> to vector<8x1xf32>
    %39 = tpu.reciprocal %38 {approx = true} : vector<8x1xf32> -> vector<8x1xf32>
    %40 = arith.truncf %36 : vector<8x8xf32> to vector<8x8xbf16>
    %cst_14 = arith.constant dense<0.000000e+00> : vector<8x32xf32>
    %41 = tpu.matmul %40, %28, %cst_14 {dimension_numbers = #tpu.dot_dimension_numbers<[1], [0], [0], [1], [0, 0, 1, 1], [], []>} : vector<8x8xbf16>, vector<8x32xbf16>, vector<8x32xf32> -> vector<8x32xf32>
    %42 = vector.broadcast %39 : vector<8x1xf32> to vector<8x32xf32>
    %43 = arith.mulf %41, %42 : vector<8x32xf32>
    %c0_15 = arith.constant 0 : index
    %c32 = arith.constant 32 : index
    %44 = vector.load %arg4[%c0_15, %c32] : memref<8x64xf32, #tpu.memory_space<vmem>>, vector<8x32xf32>
    tpu.vector_store %arg4[%c0_15, %c32], %43 {strides = array<i32>} : memref<8x64xf32, #tpu.memory_space<vmem>>, vector<8x32xf32>,
    %c0_16 = arith.constant 0 : index
    %c0_17 = arith.constant 0 : index
    %45 = vector.load %arg4[%c0_16, %c0_17] : memref<8x64xf32, #tpu.memory_space<vmem>>, vector<8x64xf32>
    %46 = arith.truncf %45 : vector<8x64xf32> to vector<8x64xbf16>
    %c0_18 = arith.constant 0 : index
    %c0_19 = arith.constant 0 : index
    %47 = vector.load %arg3[%c0_18, %c0_19] : memref<8x64xbf16, #tpu.memory_space<vmem>>, vector<8x64xbf16>
    tpu.vector_store %arg3[%c0_18, %c0_19], %46 {strides = array<i32>} : memref<8x64xbf16, #tpu.memory_space<vmem>>, vector<8x64xbf16>,
    return
  }
  func.func @transform_0(%arg0: i32) -> (i32, i32) {
    %c0_i32 = arith.constant 0 : i32
    %c0_i32_0 = arith.constant 0 : i32
    return %arg0, %c0_i32 : i32, i32
  }
  func.func @transform_1(%arg0: i32) -> (i32, i32, i32) {
    %c0_i32 = arith.constant 0 : i32
    %c0_i32_0 = arith.constant 0 : i32
    %c0_i32_1 = arith.constant 0 : i32
    return %arg0, %c0_i32, %c0_i32_0 : i32, i32, i32
  }
  func.func @transform_2(%arg0: i32) -> (i32, i32) {
    %c0_i32 = arith.constant 0 : i32
    %c0_i32_0 = arith.constant 0 : i32
    return %arg0, %c0_i32 : i32, i32
  }
}

module attributes {stable_mosaic.version = 11 : i64} {
  func.func @_linear_ln_kernel(%arg0: i32, %arg1: i32, %arg2: memref<16x64xbf16, #tpu.memory_space<vmem>>, %arg3: memref<64x64xbf16, #tpu.memory_space<vmem>>, %arg4: memref<1x64xf32, #tpu.memory_space<vmem>>, %arg5: memref<16x64xbf16, #tpu.memory_space<vmem>>, %arg6: memref<1x64xf32, #tpu.memory_space<vmem>>, %arg7: memref<1x64xf32, #tpu.memory_space<vmem>>, %arg8: memref<16x64xbf16, #tpu.memory_space<vmem>>, %arg9: memref<16x64xf32, #tpu.memory_space<vmem>>) attributes {dimension_semantics = [#tpu.dimension_semantics<parallel>, #tpu.dimension_semantics<arbitrary>], iteration_bounds = array<i64: 1, 1>, scalar_prefetch = 0 : i64, scratch_operands = 1 : i64, tpu.core_type = #tpu.core_type<tc>, window_params = [{transform_indices = @transform_0, window_bounds = array<i64: 16, 64>}, {transform_indices = @transform_1, window_bounds = array<i64: 64, 64>}, {pipeline_mode = #tpu.pipeline_mode<synchronous>, transform_indices = @transform_2, window_bounds = array<i64: 1, 64>}, {transform_indices = @transform_3, window_bounds = array<i64: 16, 64>}, {pipeline_mode = #tpu.pipeline_mode<synchronous>, transform_indices = @transform_4, window_bounds = array<i64: 1, 64>}, {pipeline_mode = #tpu.pipeline_mode<synchronous>, transform_indices = @transform_5, window_bounds = array<i64: 1, 64>}, {transform_indices = @transform_6, window_bounds = array<i64: 16, 64>}]} {
    %c0_i32 = arith.constant 0 : i32
    %0 = arith.cmpi eq, %arg1, %c0_i32 : i32
    %1 = arith.extui %0 : i1 to i32
    %c0_i32_0 = arith.constant 0 : i32
    %2 = arith.cmpi ne, %1, %c0_i32_0 : i32
    scf.if %2 {
      %cst_10 = arith.constant 0.000000e+00 : f32
      %12 = vector.broadcast %cst_10 : f32 to vector<16x64xf32>
      %c0_11 = arith.constant 0 : index
      %c0_12 = arith.constant 0 : index
      %13 = vector.load %arg9[%c0_11, %c0_12] : memref<16x64xf32, #tpu.memory_space<vmem>>, vector<16x64xf32>
      tpu.vector_store %arg9[%c0_11, %c0_12], %12 {strides = array<i32>} : memref<16x64xf32, #tpu.memory_space<vmem>>, vector<16x64xf32>,
    } else {
    }
    %c0 = arith.constant 0 : index
    %c0_1 = arith.constant 0 : index
    %3 = vector.load %arg9[%c0, %c0_1] : memref<16x64xf32, #tpu.memory_space<vmem>>, vector<16x64xf32>
    %c0_2 = arith.constant 0 : index
    %c0_3 = arith.constant 0 : index
    %4 = vector.load %arg2[%c0_2, %c0_3] : memref<16x64xbf16, #tpu.memory_space<vmem>>, vector<16x64xbf16>
    %c0_4 = arith.constant 0 : index
    %c0_5 = arith.constant 0 : index
    %5 = vector.load %arg3[%c0_4, %c0_5] : memref<64x64xbf16, #tpu.memory_space<vmem>>, vector<64x64xbf16>
    %cst = arith.constant dense<0.000000e+00> : vector<16x64xf32>
    %6 = tpu.matmul %4, %5, %cst {dimension_numbers = #tpu.dot_dimension_numbers<[1], [0], [0], [1], [0, 0, 1, 1], [], []>} : vector<16x64xbf16>, vector<64x64xbf16>, vector<16x64xf32> -> vector<16x64xf32>
    %7 = arith.addf %3, %6 : vector<16x64xf32>
    %c0_6 = arith.constant 0 : index
    %c0_7 = arith.constant 0 : index
    %8 = vector.load %arg9[%c0_6, %c0_7] : memref<16x64xf32, #tpu.memory_space<vmem>>, vector<16x64xf32>
    tpu.vector_store %arg9[%c0_6, %c0_7], %7 {strides = array<i32>} : memref<16x64xf32, #tpu.memory_space<vmem>>, vector<16x64xf32>,
    %c0_i32_8 = arith.constant 0 : i32
    %9 = arith.cmpi eq, %arg1, %c0_i32_8 : i32
    %10 = arith.extui %9 : i1 to i32
    %c0_i32_9 = arith.constant 0 : i32
    %11 = arith.cmpi ne, %10, %c0_i32_9 : i32
    scf.if %11 {
      %c0_10 = arith.constant 0 : index
      %c0_11 = arith.constant 0 : index
      %12 = vector.load %arg9[%c0_10, %c0_11] : memref<16x64xf32, #tpu.memory_space<vmem>>, vector<16x64xf32>
      %c0_12 = arith.constant 0 : index
      %c0_13 = arith.constant 0 : index
      %13 = vector.load %arg4[%c0_12, %c0_13] : memref<1x64xf32, #tpu.memory_space<vmem>>, vector<1x64xf32>
      %14 = vector.broadcast %13 : vector<1x64xf32> to vector<16x64xf32>
      %15 = arith.addf %12, %14 : vector<16x64xf32>
      %c0_14 = arith.constant 0 : index
      %c0_15 = arith.constant 0 : index
      %16 = vector.load %arg5[%c0_14, %c0_15] : memref<16x64xbf16, #tpu.memory_space<vmem>>, vector<16x64xbf16>
      %17 = arith.extf %16 : vector<16x64xbf16> to vector<16x64xf32>
      %18 = arith.addf %15, %17 : vector<16x64xf32>
      %cst_16 = arith.constant dense<0.000000e+00> : vector<16xf32>
      %19 = vector.multi_reduction <add>, %18, %cst_16 [1] : vector<16x64xf32> to vector<16xf32>
      %20 = vector.shape_cast %19 : vector<16xf32> to vector<16x1xf32>
      %cst_17 = arith.constant 6.400000e+01 : f32
      %21 = vector.broadcast %cst_17 : f32 to vector<16x1xf32>
      %22 = arith.divf %20, %21 : vector<16x1xf32>
      %23 = vector.broadcast %22 : vector<16x1xf32> to vector<16x64xf32>
      %24 = arith.subf %18, %23 : vector<16x64xf32>
      %25 = arith.mulf %24, %24 : vector<16x64xf32>
      %cst_18 = arith.constant dense<0.000000e+00> : vector<16xf32>
      %26 = vector.multi_reduction <add>, %25, %cst_18 [1] : vector<16x64xf32> to vector<16xf32>
      %27 = vector.shape_cast %26 : vector<16xf32> to vector<16x1xf32>
      %cst_19 = arith.constant 6.400000e+01 : f32
      %28 = vector.broadcast %cst_19 : f32 to vector<16x1xf32>
      %29 = arith.divf %27, %28 : vector<16x1xf32>
      %30 = vector.broadcast %22 : vector<16x1xf32> to vector<16x64xf32>
      %31 = arith.subf %18, %30 : vector<16x64xf32>
      %cst_20 = arith.constant 9.99999996E-13 : f32
      %32 = vector.broadcast %cst_20 : f32 to vector<16x1xf32>
      %33 = arith.addf %29, %32 : vector<16x1xf32>
      %34 = math.rsqrt %33 : vector<16x1xf32>
      %35 = vector.broadcast %34 : vector<16x1xf32> to vector<16x64xf32>
      %36 = arith.mulf %31, %35 : vector<16x64xf32>
      %c0_21 = arith.constant 0 : index
      %c0_22 = arith.constant 0 : index
      %37 = vector.load %arg6[%c0_21, %c0_22] : memref<1x64xf32, #tpu.memory_space<vmem>>, vector<1x64xf32>
      %38 = vector.broadcast %37 : vector<1x64xf32> to vector<16x64xf32>
      %39 = arith.mulf %36, %38 : vector<16x64xf32>
      %c0_23 = arith.constant 0 : index
      %c0_24 = arith.constant 0 : index
      %40 = vector.load %arg7[%c0_23, %c0_24] : memref<1x64xf32, #tpu.memory_space<vmem>>, vector<1x64xf32>
      %41 = vector.broadcast %40 : vector<1x64xf32> to vector<16x64xf32>
      %42 = arith.addf %39, %41 : vector<16x64xf32>
      %43 = arith.truncf %42 : vector<16x64xf32> to vector<16x64xbf16>
      %c0_25 = arith.constant 0 : index
      %c0_26 = arith.constant 0 : index
      %44 = vector.load %arg8[%c0_25, %c0_26] : memref<16x64xbf16, #tpu.memory_space<vmem>>, vector<16x64xbf16>
      tpu.vector_store %arg8[%c0_25, %c0_26], %43 {strides = array<i32>} : memref<16x64xbf16, #tpu.memory_space<vmem>>, vector<16x64xbf16>,
    } else {
    }
    return
  }
  func.func @transform_0(%arg0: i32, %arg1: i32) -> (i32, i32) {
    %c0_i32 = arith.constant 0 : i32
    return %arg0, %arg1 : i32, i32
  }
  func.func @transform_1(%arg0: i32, %arg1: i32) -> (i32, i32) {
    %c0_i32 = arith.constant 0 : i32
    %c0_i32_0 = arith.constant 0 : i32
    return %arg1, %c0_i32 : i32, i32
  }
  func.func @transform_2(%arg0: i32, %arg1: i32) -> (i32, i32) {
    %c0_i32 = arith.constant 0 : i32
    %c0_i32_0 = arith.constant 0 : i32
    %c0_i32_1 = arith.constant 0 : i32
    return %c0_i32, %c0_i32_0 : i32, i32
  }
  func.func @transform_3(%arg0: i32, %arg1: i32) -> (i32, i32) {
    %c0_i32 = arith.constant 0 : i32
    %c0_i32_0 = arith.constant 0 : i32
    return %arg0, %c0_i32 : i32, i32
  }
  func.func @transform_4(%arg0: i32, %arg1: i32) -> (i32, i32) {
    %c0_i32 = arith.constant 0 : i32
    %c0_i32_0 = arith.constant 0 : i32
    %c0_i32_1 = arith.constant 0 : i32
    return %c0_i32, %c0_i32_0 : i32, i32
  }
  func.func @transform_5(%arg0: i32, %arg1: i32) -> (i32, i32) {
    %c0_i32 = arith.constant 0 : i32
    %c0_i32_0 = arith.constant 0 : i32
    %c0_i32_1 = arith.constant 0 : i32
    return %c0_i32, %c0_i32_0 : i32, i32
  }
  func.func @transform_6(%arg0: i32, %arg1: i32) -> (i32, i32) {
    %c0_i32 = arith.constant 0 : i32
    %c0_i32_0 = arith.constant 0 : i32
    return %arg0, %c0_i32 : i32, i32
  }
}

module attributes {stable_mosaic.version = 11 : i64} {
  func.func @_linear_kernel(%arg0: i32, %arg1: i32, %arg2: i32, %arg3: memref<16x64xbf16, #tpu.memory_space<vmem>>, %arg4: memref<64x128xbf16, #tpu.memory_space<vmem>>, %arg5: memref<1x128xf32, #tpu.memory_space<vmem>>, %arg6: memref<16x128xbf16, #tpu.memory_space<vmem>>, %arg7: memref<16x128xf32, #tpu.memory_space<vmem>>) attributes {dimension_semantics = [#tpu.dimension_semantics<parallel>, #tpu.dimension_semantics<parallel>, #tpu.dimension_semantics<arbitrary>], iteration_bounds = array<i64: 1, 1, 1>, scalar_prefetch = 0 : i64, scratch_operands = 1 : i64, tpu.core_type = #tpu.core_type<tc>, window_params = [{transform_indices = @transform_0, window_bounds = array<i64: 16, 64>}, {transform_indices = @transform_1, window_bounds = array<i64: 64, 128>}, {transform_indices = @transform_2, window_bounds = array<i64: 1, 128>}, {transform_indices = @transform_3, window_bounds = array<i64: 16, 128>}]} {
    %c0_i32 = arith.constant 0 : i32
    %0 = arith.cmpi eq, %arg2, %c0_i32 : i32
    %1 = arith.extui %0 : i1 to i32
    %c0_i32_0 = arith.constant 0 : i32
    %2 = arith.cmpi ne, %1, %c0_i32_0 : i32
    scf.if %2 {
      %cst_10 = arith.constant 0.000000e+00 : f32
      %12 = vector.broadcast %cst_10 : f32 to vector<16x128xf32>
      %c0_11 = arith.constant 0 : index
      %c0_12 = arith.constant 0 : index
      %13 = vector.load %arg7[%c0_11, %c0_12] : memref<16x128xf32, #tpu.memory_space<vmem>>, vector<16x128xf32>
      tpu.vector_store %arg7[%c0_11, %c0_12], %12 {strides = array<i32>} : memref<16x128xf32, #tpu.memory_space<vmem>>, vector<16x128xf32>,
    } else {
    }
    %c0 = arith.constant 0 : index
    %c0_1 = arith.constant 0 : index
    %3 = vector.load %arg7[%c0, %c0_1] : memref<16x128xf32, #tpu.memory_space<vmem>>, vector<16x128xf32>
    %c0_2 = arith.constant 0 : index
    %c0_3 = arith.constant 0 : index
    %4 = vector.load %arg3[%c0_2, %c0_3] : memref<16x64xbf16, #tpu.memory_space<vmem>>, vector<16x64xbf16>
    %c0_4 = arith.constant 0 : index
    %c0_5 = arith.constant 0 : index
    %5 = vector.load %arg4[%c0_4, %c0_5] : memref<64x128xbf16, #tpu.memory_space<vmem>>, vector<64x128xbf16>
    %cst = arith.constant dense<0.000000e+00> : vector<16x128xf32>
    %6 = tpu.matmul %4, %5, %cst {dimension_numbers = #tpu.dot_dimension_numbers<[1], [0], [0], [1], [0, 0, 1, 1], [], []>} : vector<16x64xbf16>, vector<64x128xbf16>, vector<16x128xf32> -> vector<16x128xf32>
    %7 = arith.addf %3, %6 : vector<16x128xf32>
    %c0_6 = arith.constant 0 : index
    %c0_7 = arith.constant 0 : index
    %8 = vector.load %arg7[%c0_6, %c0_7] : memref<16x128xf32, #tpu.memory_space<vmem>>, vector<16x128xf32>
    tpu.vector_store %arg7[%c0_6, %c0_7], %7 {strides = array<i32>} : memref<16x128xf32, #tpu.memory_space<vmem>>, vector<16x128xf32>,
    %c0_i32_8 = arith.constant 0 : i32
    %9 = arith.cmpi eq, %arg2, %c0_i32_8 : i32
    %10 = arith.extui %9 : i1 to i32
    %c0_i32_9 = arith.constant 0 : i32
    %11 = arith.cmpi ne, %10, %c0_i32_9 : i32
    scf.if %11 {
      %c0_10 = arith.constant 0 : index
      %c0_11 = arith.constant 0 : index
      %12 = vector.load %arg7[%c0_10, %c0_11] : memref<16x128xf32, #tpu.memory_space<vmem>>, vector<16x128xf32>
      %c0_12 = arith.constant 0 : index
      %c0_13 = arith.constant 0 : index
      %13 = vector.load %arg5[%c0_12, %c0_13] : memref<1x128xf32, #tpu.memory_space<vmem>>, vector<1x128xf32>
      %14 = vector.broadcast %13 : vector<1x128xf32> to vector<16x128xf32>
      %15 = arith.addf %12, %14 : vector<16x128xf32>
      %16 = arith.mulf %15, %15 : vector<16x128xf32>
      %17 = arith.mulf %15, %16 : vector<16x128xf32>
      %cst_14 = arith.constant 4.471500e-02 : f32
      %18 = vector.broadcast %cst_14 : f32 to vector<16x128xf32>
      %19 = arith.mulf %18, %17 : vector<16x128xf32>
      %20 = arith.addf %15, %19 : vector<16x128xf32>
      %cst_15 = arith.constant 0.797884583 : f32
      %21 = vector.broadcast %cst_15 : f32 to vector<16x128xf32>
      %22 = arith.mulf %21, %20 : vector<16x128xf32>
      %23 = math.tanh %22 : vector<16x128xf32>
      %cst_16 = arith.constant 1.000000e+00 : f32
      %24 = vector.broadcast %cst_16 : f32 to vector<16x128xf32>
      %25 = arith.addf %24, %23 : vector<16x128xf32>
      %cst_17 = arith.constant 5.000000e-01 : f32
      %26 = vector.broadcast %cst_17 : f32 to vector<16x128xf32>
      %27 = arith.mulf %26, %25 : vector<16x128xf32>
      %28 = arith.mulf %15, %27 : vector<16x128xf32>
      %29 = arith.truncf %28 : vector<16x128xf32> to vector<16x128xbf16>
      %c0_18 = arith.constant 0 : index
      %c0_19 = arith.constant 0 : index
      %30 = vector.load %arg6[%c0_18, %c0_19] : memref<16x128xbf16, #tpu.memory_space<vmem>>, vector<16x128xbf16>
      tpu.vector_store %arg6[%c0_18, %c0_19], %29 {strides = array<i32>} : memref<16x128xbf16, #tpu.memory_space<vmem>>, vector<16x128xbf16>,
    } else {
    }
    return
  }
  func.func @transform_0(%arg0: i32, %arg1: i32, %arg2: i32) -> (i32, i32) {
    %c0_i32 = arith.constant 0 : i32
    return %arg0, %arg2 : i32, i32
  }
  func.func @transform_1(%arg0: i32, %arg1: i32, %arg2: i32) -> (i32, i32) {
    %c0_i32 = arith.constant 0 : i32
    return %arg2, %arg1 : i32, i32
  }
  func.func @transform_2(%arg0: i32, %arg1: i32, %arg2: i32) -> (i32, i32) {
    %c0_i32 = arith.constant 0 : i32
    %c0_i32_0 = arith.constant 0 : i32
    return %c0_i32, %arg1 : i32, i32
  }
  func.func @transform_3(%arg0: i32, %arg1: i32, %arg2: i32) -> (i32, i32) {
    %c0_i32 = arith.constant 0 : i32
    return %arg0, %arg1 : i32, i32
  }
}

module attributes {stable_mosaic.version = 11 : i64} {
  func.func @_linear_ln_kernel(%arg0: i32, %arg1: i32, %arg2: memref<16x128xbf16, #tpu.memory_space<vmem>>, %arg3: memref<128x64xbf16, #tpu.memory_space<vmem>>, %arg4: memref<1x64xf32, #tpu.memory_space<vmem>>, %arg5: memref<16x64xbf16, #tpu.memory_space<vmem>>, %arg6: memref<1x64xf32, #tpu.memory_space<vmem>>, %arg7: memref<1x64xf32, #tpu.memory_space<vmem>>, %arg8: memref<16x64xbf16, #tpu.memory_space<vmem>>, %arg9: memref<16x64xf32, #tpu.memory_space<vmem>>) attributes {dimension_semantics = [#tpu.dimension_semantics<parallel>, #tpu.dimension_semantics<arbitrary>], iteration_bounds = array<i64: 1, 1>, scalar_prefetch = 0 : i64, scratch_operands = 1 : i64, tpu.core_type = #tpu.core_type<tc>, window_params = [{transform_indices = @transform_0, window_bounds = array<i64: 16, 128>}, {transform_indices = @transform_1, window_bounds = array<i64: 128, 64>}, {pipeline_mode = #tpu.pipeline_mode<synchronous>, transform_indices = @transform_2, window_bounds = array<i64: 1, 64>}, {transform_indices = @transform_3, window_bounds = array<i64: 16, 64>}, {pipeline_mode = #tpu.pipeline_mode<synchronous>, transform_indices = @transform_4, window_bounds = array<i64: 1, 64>}, {pipeline_mode = #tpu.pipeline_mode<synchronous>, transform_indices = @transform_5, window_bounds = array<i64: 1, 64>}, {transform_indices = @transform_6, window_bounds = array<i64: 16, 64>}]} {
    %c0_i32 = arith.constant 0 : i32
    %0 = arith.cmpi eq, %arg1, %c0_i32 : i32
    %1 = arith.extui %0 : i1 to i32
    %c0_i32_0 = arith.constant 0 : i32
    %2 = arith.cmpi ne, %1, %c0_i32_0 : i32
    scf.if %2 {
      %cst_10 = arith.constant 0.000000e+00 : f32
      %12 = vector.broadcast %cst_10 : f32 to vector<16x64xf32>
      %c0_11 = arith.constant 0 : index
      %c0_12 = arith.constant 0 : index
      %13 = vector.load %arg9[%c0_11, %c0_12] : memref<16x64xf32, #tpu.memory_space<vmem>>, vector<16x64xf32>
      tpu.vector_store %arg9[%c0_11, %c0_12], %12 {strides = array<i32>} : memref<16x64xf32, #tpu.memory_space<vmem>>, vector<16x64xf32>,
    } else {
    }
    %c0 = arith.constant 0 : index
    %c0_1 = arith.constant 0 : index
    %3 = vector.load %arg9[%c0, %c0_1] : memref<16x64xf32, #tpu.memory_space<vmem>>, vector<16x64xf32>
    %c0_2 = arith.constant 0 : index
    %c0_3 = arith.constant 0 : index
    %4 = vector.load %arg2[%c0_2, %c0_3] : memref<16x128xbf16, #tpu.memory_space<vmem>>, vector<16x128xbf16>
    %c0_4 = arith.constant 0 : index
    %c0_5 = arith.constant 0 : index
    %5 = vector.load %arg3[%c0_4, %c0_5] : memref<128x64xbf16, #tpu.memory_space<vmem>>, vector<128x64xbf16>
    %cst = arith.constant dense<0.000000e+00> : vector<16x64xf32>
    %6 = tpu.matmul %4, %5, %cst {dimension_numbers = #tpu.dot_dimension_numbers<[1], [0], [0], [1], [0, 0, 1, 1], [], []>} : vector<16x128xbf16>, vector<128x64xbf16>, vector<16x64xf32> -> vector<16x64xf32>
    %7 = arith.addf %3, %6 : vector<16x64xf32>
    %c0_6 = arith.constant 0 : index
    %c0_7 = arith.constant 0 : index
    %8 = vector.load %arg9[%c0_6, %c0_7] : memref<16x64xf32, #tpu.memory_space<vmem>>, vector<16x64xf32>
    tpu.vector_store %arg9[%c0_6, %c0_7], %7 {strides = array<i32>} : memref<16x64xf32, #tpu.memory_space<vmem>>, vector<16x64xf32>,
    %c0_i32_8 = arith.constant 0 : i32
    %9 = arith.cmpi eq, %arg1, %c0_i32_8 : i32
    %10 = arith.extui %9 : i1 to i32
    %c0_i32_9 = arith.constant 0 : i32
    %11 = arith.cmpi ne, %10, %c0_i32_9 : i32
    scf.if %11 {
      %c0_10 = arith.constant 0 : index
      %c0_11 = arith.constant 0 : index
      %12 = vector.load %arg9[%c0_10, %c0_11] : memref<16x64xf32, #tpu.memory_space<vmem>>, vector<16x64xf32>
      %c0_12 = arith.constant 0 : index
      %c0_13 = arith.constant 0 : index
      %13 = vector.load %arg4[%c0_12, %c0_13] : memref<1x64xf32, #tpu.memory_space<vmem>>, vector<1x64xf32>
      %14 = vector.broadcast %13 : vector<1x64xf32> to vector<16x64xf32>
      %15 = arith.addf %12, %14 : vector<16x64xf32>
      %c0_14 = arith.constant 0 : index
      %c0_15 = arith.constant 0 : index
      %16 = vector.load %arg5[%c0_14, %c0_15] : memref<16x64xbf16, #tpu.memory_space<vmem>>, vector<16x64xbf16>
      %17 = arith.extf %16 : vector<16x64xbf16> to vector<16x64xf32>
      %18 = arith.addf %15, %17 : vector<16x64xf32>
      %cst_16 = arith.constant dense<0.000000e+00> : vector<16xf32>
      %19 = vector.multi_reduction <add>, %18, %cst_16 [1] : vector<16x64xf32> to vector<16xf32>
      %20 = vector.shape_cast %19 : vector<16xf32> to vector<16x1xf32>
      %cst_17 = arith.constant 6.400000e+01 : f32
      %21 = vector.broadcast %cst_17 : f32 to vector<16x1xf32>
      %22 = arith.divf %20, %21 : vector<16x1xf32>
      %23 = vector.broadcast %22 : vector<16x1xf32> to vector<16x64xf32>
      %24 = arith.subf %18, %23 : vector<16x64xf32>
      %25 = arith.mulf %24, %24 : vector<16x64xf32>
      %cst_18 = arith.constant dense<0.000000e+00> : vector<16xf32>
      %26 = vector.multi_reduction <add>, %25, %cst_18 [1] : vector<16x64xf32> to vector<16xf32>
      %27 = vector.shape_cast %26 : vector<16xf32> to vector<16x1xf32>
      %cst_19 = arith.constant 6.400000e+01 : f32
      %28 = vector.broadcast %cst_19 : f32 to vector<16x1xf32>
      %29 = arith.divf %27, %28 : vector<16x1xf32>
      %30 = vector.broadcast %22 : vector<16x1xf32> to vector<16x64xf32>
      %31 = arith.subf %18, %30 : vector<16x64xf32>
      %cst_20 = arith.constant 9.99999996E-13 : f32
      %32 = vector.broadcast %cst_20 : f32 to vector<16x1xf32>
      %33 = arith.addf %29, %32 : vector<16x1xf32>
      %34 = math.rsqrt %33 : vector<16x1xf32>
      %35 = vector.broadcast %34 : vector<16x1xf32> to vector<16x64xf32>
      %36 = arith.mulf %31, %35 : vector<16x64xf32>
      %c0_21 = arith.constant 0 : index
      %c0_22 = arith.constant 0 : index
      %37 = vector.load %arg6[%c0_21, %c0_22] : memref<1x64xf32, #tpu.memory_space<vmem>>, vector<1x64xf32>
      %38 = vector.broadcast %37 : vector<1x64xf32> to vector<16x64xf32>
      %39 = arith.mulf %36, %38 : vector<16x64xf32>
      %c0_23 = arith.constant 0 : index
      %c0_24 = arith.constant 0 : index
      %40 = vector.load %arg7[%c0_23, %c0_24] : memref<1x64xf32, #tpu.memory_space<vmem>>, vector<1x64xf32>
      %41 = vector.broadcast %40 : vector<1x64xf32> to vector<16x64xf32>
      %42 = arith.addf %39, %41 : vector<16x64xf32>
      %43 = arith.truncf %42 : vector<16x64xf32> to vector<16x64xbf16>
      %c0_25 = arith.constant 0 : index
      %c0_26 = arith.constant 0 : index
      %44 = vector.load %arg8[%c0_25, %c0_26] : memref<16x64xbf16, #tpu.memory_space<vmem>>, vector<16x64xbf16>
      tpu.vector_store %arg8[%c0_25, %c0_26], %43 {strides = array<i32>} : memref<16x64xbf16, #tpu.memory_space<vmem>>, vector<16x64xbf16>,
    } else {
    }
    return
  }
  func.func @transform_0(%arg0: i32, %arg1: i32) -> (i32, i32) {
    %c0_i32 = arith.constant 0 : i32
    return %arg0, %arg1 : i32, i32
  }
  func.func @transform_1(%arg0: i32, %arg1: i32) -> (i32, i32) {
    %c0_i32 = arith.constant 0 : i32
    %c0_i32_0 = arith.constant 0 : i32
    return %arg1, %c0_i32 : i32, i32
  }
  func.func @transform_2(%arg0: i32, %arg1: i32) -> (i32, i32) {
    %c0_i32 = arith.constant 0 : i32
    %c0_i32_0 = arith.constant 0 : i32
    %c0_i32_1 = arith.constant 0 : i32
    return %c0_i32, %c0_i32_0 : i32, i32
  }
  func.func @transform_3(%arg0: i32, %arg1: i32) -> (i32, i32) {
    %c0_i32 = arith.constant 0 : i32
    %c0_i32_0 = arith.constant 0 : i32
    return %arg0, %c0_i32 : i32, i32
  }
  func.func @transform_4(%arg0: i32, %arg1: i32) -> (i32, i32) {
    %c0_i32 = arith.constant 0 : i32
    %c0_i32_0 = arith.constant 0 : i32
    %c0_i32_1 = arith.constant 0 : i32
    return %c0_i32, %c0_i32_0 : i32, i32
  }
  func.func @transform_5(%arg0: i32, %arg1: i32) -> (i32, i32) {
    %c0_i32 = arith.constant 0 : i32
    %c0_i32_0 = arith.constant 0 : i32
    %c0_i32_1 = arith.constant 0 : i32
    return %c0_i32, %c0_i32_0 : i32, i32
  }
  func.func @transform_6(%arg0: i32, %arg1: i32) -> (i32, i32) {
    %c0_i32 = arith.constant 0 : i32
    %c0_i32_0 = arith.constant 0 : i32
    return %arg0, %c0_i32 : i32, i32
  }
}

module attributes {stable_mosaic.version = 11 : i64} {
  func.func @_linear_ln_kernel(%arg0: i32, %arg1: i32, %arg2: memref<8x64xbf16, #tpu.memory_space<vmem>>, %arg3: memref<64x64xbf16, #tpu.memory_space<vmem>>, %arg4: memref<1x64xf32, #tpu.memory_space<vmem>>, %arg5: memref<1x64xf32, #tpu.memory_space<vmem>>, %arg6: memref<1x64xf32, #tpu.memory_space<vmem>>, %arg7: memref<8x64xbf16, #tpu.memory_space<vmem>>, %arg8: memref<8x64xf32, #tpu.memory_space<vmem>>) attributes {dimension_semantics = [#tpu.dimension_semantics<parallel>, #tpu.dimension_semantics<arbitrary>], iteration_bounds = array<i64: 1, 1>, scalar_prefetch = 0 : i64, scratch_operands = 1 : i64, tpu.core_type = #tpu.core_type<tc>, window_params = [{transform_indices = @transform_0, window_bounds = array<i64: 8, 64>}, {transform_indices = @transform_1, window_bounds = array<i64: 64, 64>}, {pipeline_mode = #tpu.pipeline_mode<synchronous>, transform_indices = @transform_2, window_bounds = array<i64: 1, 64>}, {pipeline_mode = #tpu.pipeline_mode<synchronous>, transform_indices = @transform_3, window_bounds = array<i64: 1, 64>}, {pipeline_mode = #tpu.pipeline_mode<synchronous>, transform_indices = @transform_4, window_bounds = array<i64: 1, 64>}, {transform_indices = @transform_5, window_bounds = array<i64: 8, 64>}]} {
    %c0_i32 = arith.constant 0 : i32
    %0 = arith.cmpi eq, %arg1, %c0_i32 : i32
    %1 = arith.extui %0 : i1 to i32
    %c0_i32_0 = arith.constant 0 : i32
    %2 = arith.cmpi ne, %1, %c0_i32_0 : i32
    scf.if %2 {
      %cst_10 = arith.constant 0.000000e+00 : f32
      %12 = vector.broadcast %cst_10 : f32 to vector<8x64xf32>
      %c0_11 = arith.constant 0 : index
      %c0_12 = arith.constant 0 : index
      %13 = vector.load %arg8[%c0_11, %c0_12] : memref<8x64xf32, #tpu.memory_space<vmem>>, vector<8x64xf32>
      tpu.vector_store %arg8[%c0_11, %c0_12], %12 {strides = array<i32>} : memref<8x64xf32, #tpu.memory_space<vmem>>, vector<8x64xf32>,
    } else {
    }
    %c0 = arith.constant 0 : index
    %c0_1 = arith.constant 0 : index
    %3 = vector.load %arg8[%c0, %c0_1] : memref<8x64xf32, #tpu.memory_space<vmem>>, vector<8x64xf32>
    %c0_2 = arith.constant 0 : index
    %c0_3 = arith.constant 0 : index
    %4 = vector.load %arg2[%c0_2, %c0_3] : memref<8x64xbf16, #tpu.memory_space<vmem>>, vector<8x64xbf16>
    %c0_4 = arith.constant 0 : index
    %c0_5 = arith.constant 0 : index
    %5 = vector.load %arg3[%c0_4, %c0_5] : memref<64x64xbf16, #tpu.memory_space<vmem>>, vector<64x64xbf16>
    %cst = arith.constant dense<0.000000e+00> : vector<8x64xf32>
    %6 = tpu.matmul %4, %5, %cst {dimension_numbers = #tpu.dot_dimension_numbers<[1], [0], [0], [1], [0, 0, 1, 1], [], []>} : vector<8x64xbf16>, vector<64x64xbf16>, vector<8x64xf32> -> vector<8x64xf32>
    %7 = arith.addf %3, %6 : vector<8x64xf32>
    %c0_6 = arith.constant 0 : index
    %c0_7 = arith.constant 0 : index
    %8 = vector.load %arg8[%c0_6, %c0_7] : memref<8x64xf32, #tpu.memory_space<vmem>>, vector<8x64xf32>
    tpu.vector_store %arg8[%c0_6, %c0_7], %7 {strides = array<i32>} : memref<8x64xf32, #tpu.memory_space<vmem>>, vector<8x64xf32>,
    %c0_i32_8 = arith.constant 0 : i32
    %9 = arith.cmpi eq, %arg1, %c0_i32_8 : i32
    %10 = arith.extui %9 : i1 to i32
    %c0_i32_9 = arith.constant 0 : i32
    %11 = arith.cmpi ne, %10, %c0_i32_9 : i32
    scf.if %11 {
      %c0_10 = arith.constant 0 : index
      %c0_11 = arith.constant 0 : index
      %12 = vector.load %arg8[%c0_10, %c0_11] : memref<8x64xf32, #tpu.memory_space<vmem>>, vector<8x64xf32>
      %c0_12 = arith.constant 0 : index
      %c0_13 = arith.constant 0 : index
      %13 = vector.load %arg4[%c0_12, %c0_13] : memref<1x64xf32, #tpu.memory_space<vmem>>, vector<1x64xf32>
      %14 = vector.broadcast %13 : vector<1x64xf32> to vector<8x64xf32>
      %15 = arith.addf %12, %14 : vector<8x64xf32>
      %cst_14 = arith.constant 0.000000e+00 : f32
      %16 = vector.broadcast %cst_14 : f32 to vector<8x64xf32>
      %17 = arith.maximumf %15, %16 : vector<8x64xf32>
      %cst_15 = arith.constant dense<0.000000e+00> : vector<8xf32>
      %18 = vector.multi_reduction <add>, %17, %cst_15 [1] : vector<8x64xf32> to vector<8xf32>
      %19 = vector.shape_cast %18 : vector<8xf32> to vector<8x1xf32>
      %cst_16 = arith.constant 6.400000e+01 : f32
      %20 = vector.broadcast %cst_16 : f32 to vector<8x1xf32>
      %21 = arith.divf %19, %20 : vector<8x1xf32>
      %22 = vector.broadcast %21 : vector<8x1xf32> to vector<8x64xf32>
      %23 = arith.subf %17, %22 : vector<8x64xf32>
      %24 = arith.mulf %23, %23 : vector<8x64xf32>
      %cst_17 = arith.constant dense<0.000000e+00> : vector<8xf32>
      %25 = vector.multi_reduction <add>, %24, %cst_17 [1] : vector<8x64xf32> to vector<8xf32>
      %26 = vector.shape_cast %25 : vector<8xf32> to vector<8x1xf32>
      %cst_18 = arith.constant 6.400000e+01 : f32
      %27 = vector.broadcast %cst_18 : f32 to vector<8x1xf32>
      %28 = arith.divf %26, %27 : vector<8x1xf32>
      %29 = vector.broadcast %21 : vector<8x1xf32> to vector<8x64xf32>
      %30 = arith.subf %17, %29 : vector<8x64xf32>
      %cst_19 = arith.constant 9.99999996E-13 : f32
      %31 = vector.broadcast %cst_19 : f32 to vector<8x1xf32>
      %32 = arith.addf %28, %31 : vector<8x1xf32>
      %33 = math.rsqrt %32 : vector<8x1xf32>
      %34 = vector.broadcast %33 : vector<8x1xf32> to vector<8x64xf32>
      %35 = arith.mulf %30, %34 : vector<8x64xf32>
      %c0_20 = arith.constant 0 : index
      %c0_21 = arith.constant 0 : index
      %36 = vector.load %arg5[%c0_20, %c0_21] : memref<1x64xf32, #tpu.memory_space<vmem>>, vector<1x64xf32>
      %37 = vector.broadcast %36 : vector<1x64xf32> to vector<8x64xf32>
      %38 = arith.mulf %35, %37 : vector<8x64xf32>
      %c0_22 = arith.constant 0 : index
      %c0_23 = arith.constant 0 : index
      %39 = vector.load %arg6[%c0_22, %c0_23] : memref<1x64xf32, #tpu.memory_space<vmem>>, vector<1x64xf32>
      %40 = vector.broadcast %39 : vector<1x64xf32> to vector<8x64xf32>
      %41 = arith.addf %38, %40 : vector<8x64xf32>
      %42 = arith.truncf %41 : vector<8x64xf32> to vector<8x64xbf16>
      %c0_24 = arith.constant 0 : index
      %c0_25 = arith.constant 0 : index
      %43 = vector.load %arg7[%c0_24, %c0_25] : memref<8x64xbf16, #tpu.memory_space<vmem>>, vector<8x64xbf16>
      tpu.vector_store %arg7[%c0_24, %c0_25], %42 {strides = array<i32>} : memref<8x64xbf16, #tpu.memory_space<vmem>>, vector<8x64xbf16>,
    } else {
    }
    return
  }
  func.func @transform_0(%arg0: i32, %arg1: i32) -> (i32, i32) {
    %c0_i32 = arith.constant 0 : i32
    return %arg0, %arg1 : i32, i32
  }
  func.func @transform_1(%arg0: i32, %arg1: i32) -> (i32, i32) {
    %c0_i32 = arith.constant 0 : i32
    %c0_i32_0 = arith.constant 0 : i32
    return %arg1, %c0_i32 : i32, i32
  }
  func.func @transform_2(%arg0: i32, %arg1: i32) -> (i32, i32) {
    %c0_i32 = arith.constant 0 : i32
    %c0_i32_0 = arith.constant 0 : i32
    %c0_i32_1 = arith.constant 0 : i32
    return %c0_i32, %c0_i32_0 : i32, i32
  }
  func.func @transform_3(%arg0: i32, %arg1: i32) -> (i32, i32) {
    %c0_i32 = arith.constant 0 : i32
    %c0_i32_0 = arith.constant 0 : i32
    %c0_i32_1 = arith.constant 0 : i32
    return %c0_i32, %c0_i32_0 : i32, i32
  }
  func.func @transform_4(%arg0: i32, %arg1: i32) -> (i32, i32) {
    %c0_i32 = arith.constant 0 : i32
    %c0_i32_0 = arith.constant 0 : i32
    %c0_i32_1 = arith.constant 0 : i32
    return %c0_i32, %c0_i32_0 : i32, i32
  }
  func.func @transform_5(%arg0: i32, %arg1: i32) -> (i32, i32) {
    %c0_i32 = arith.constant 0 : i32
    %c0_i32_0 = arith.constant 0 : i32
    return %arg0, %c0_i32 : i32, i32
  }
}

module attributes {stable_mosaic.version = 11 : i64} {
  func.func @_linear_kernel(%arg0: i32, %arg1: i32, %arg2: i32, %arg3: memref<8x64xbf16, #tpu.memory_space<vmem>>, %arg4: memref<64x640xbf16, #tpu.memory_space<vmem>>, %arg5: memref<1x640xf32, #tpu.memory_space<vmem>>, %arg6: memref<8x640xbf16, #tpu.memory_space<vmem>>, %arg7: memref<8x640xf32, #tpu.memory_space<vmem>>) attributes {dimension_semantics = [#tpu.dimension_semantics<parallel>, #tpu.dimension_semantics<parallel>, #tpu.dimension_semantics<arbitrary>], iteration_bounds = array<i64: 1, 2, 1>, scalar_prefetch = 0 : i64, scratch_operands = 1 : i64, tpu.core_type = #tpu.core_type<tc>, window_params = [{transform_indices = @transform_0, window_bounds = array<i64: 8, 64>}, {transform_indices = @transform_1, window_bounds = array<i64: 64, 640>}, {transform_indices = @transform_2, window_bounds = array<i64: 1, 640>}, {transform_indices = @transform_3, window_bounds = array<i64: 8, 640>}]} {
    %c0_i32 = arith.constant 0 : i32
    %0 = arith.cmpi eq, %arg2, %c0_i32 : i32
    %1 = arith.extui %0 : i1 to i32
    %c0_i32_0 = arith.constant 0 : i32
    %2 = arith.cmpi ne, %1, %c0_i32_0 : i32
    scf.if %2 {
      %cst_10 = arith.constant 0.000000e+00 : f32
      %12 = vector.broadcast %cst_10 : f32 to vector<8x640xf32>
      %c0_11 = arith.constant 0 : index
      %c0_12 = arith.constant 0 : index
      %13 = vector.load %arg7[%c0_11, %c0_12] : memref<8x640xf32, #tpu.memory_space<vmem>>, vector<8x640xf32>
      tpu.vector_store %arg7[%c0_11, %c0_12], %12 {strides = array<i32>} : memref<8x640xf32, #tpu.memory_space<vmem>>, vector<8x640xf32>,
    } else {
    }
    %c0 = arith.constant 0 : index
    %c0_1 = arith.constant 0 : index
    %3 = vector.load %arg7[%c0, %c0_1] : memref<8x640xf32, #tpu.memory_space<vmem>>, vector<8x640xf32>
    %c0_2 = arith.constant 0 : index
    %c0_3 = arith.constant 0 : index
    %4 = vector.load %arg3[%c0_2, %c0_3] : memref<8x64xbf16, #tpu.memory_space<vmem>>, vector<8x64xbf16>
    %c0_4 = arith.constant 0 : index
    %c0_5 = arith.constant 0 : index
    %5 = vector.load %arg4[%c0_4, %c0_5] : memref<64x640xbf16, #tpu.memory_space<vmem>>, vector<64x640xbf16>
    %cst = arith.constant dense<0.000000e+00> : vector<8x640xf32>
    %6 = tpu.matmul %4, %5, %cst {dimension_numbers = #tpu.dot_dimension_numbers<[1], [0], [0], [1], [0, 0, 1, 1], [], []>} : vector<8x64xbf16>, vector<64x640xbf16>, vector<8x640xf32> -> vector<8x640xf32>
    %7 = arith.addf %3, %6 : vector<8x640xf32>
    %c0_6 = arith.constant 0 : index
    %c0_7 = arith.constant 0 : index
    %8 = vector.load %arg7[%c0_6, %c0_7] : memref<8x640xf32, #tpu.memory_space<vmem>>, vector<8x640xf32>
    tpu.vector_store %arg7[%c0_6, %c0_7], %7 {strides = array<i32>} : memref<8x640xf32, #tpu.memory_space<vmem>>, vector<8x640xf32>,
    %c0_i32_8 = arith.constant 0 : i32
    %9 = arith.cmpi eq, %arg2, %c0_i32_8 : i32
    %10 = arith.extui %9 : i1 to i32
    %c0_i32_9 = arith.constant 0 : i32
    %11 = arith.cmpi ne, %10, %c0_i32_9 : i32
    scf.if %11 {
      %c0_10 = arith.constant 0 : index
      %c0_11 = arith.constant 0 : index
      %12 = vector.load %arg7[%c0_10, %c0_11] : memref<8x640xf32, #tpu.memory_space<vmem>>, vector<8x640xf32>
      %c0_12 = arith.constant 0 : index
      %c0_13 = arith.constant 0 : index
      %13 = vector.load %arg5[%c0_12, %c0_13] : memref<1x640xf32, #tpu.memory_space<vmem>>, vector<1x640xf32>
      %14 = vector.broadcast %13 : vector<1x640xf32> to vector<8x640xf32>
      %15 = arith.addf %12, %14 : vector<8x640xf32>
      %16 = arith.truncf %15 : vector<8x640xf32> to vector<8x640xbf16>
      %c0_14 = arith.constant 0 : index
      %c0_15 = arith.constant 0 : index
      %17 = vector.load %arg6[%c0_14, %c0_15] : memref<8x640xbf16, #tpu.memory_space<vmem>>, vector<8x640xbf16>
      tpu.vector_store %arg6[%c0_14, %c0_15], %16 {strides = array<i32>} : memref<8x640xbf16, #tpu.memory_space<vmem>>, vector<8x640xbf16>,
    } else {
    }
    return
  }
  func.func @transform_0(%arg0: i32, %arg1: i32, %arg2: i32) -> (i32, i32) {
    %c0_i32 = arith.constant 0 : i32
    return %arg0, %arg2 : i32, i32
  }
  func.func @transform_1(%arg0: i32, %arg1: i32, %arg2: i32) -> (i32, i32) {
    %c0_i32 = arith.constant 0 : i32
    return %arg2, %arg1 : i32, i32
  }
  func.func @transform_2(%arg0: i32, %arg1: i32, %arg2: i32) -> (i32, i32) {
    %c0_i32 = arith.constant 0 : i32
    %c0_i32_0 = arith.constant 0 : i32
    return %c0_i32, %arg1 : i32, i32
  }
  func.func @transform_3(%arg0: i32, %arg1: i32, %arg2: i32) -> (i32, i32) {
    %c0_i32 = arith.constant 0 : i32
    return %arg0, %arg1 : i32, i32
  }
}

module attributes {stable_mosaic.version = 11 : i64} {
  func.func @_pooler_nsp_kernel(%arg0: i32, %arg1: memref<2x64xbf16, #tpu.memory_space<vmem>>, %arg2: memref<64x64xbf16, #tpu.memory_space<vmem>>, %arg3: memref<1x64xf32, #tpu.memory_space<vmem>>, %arg4: memref<64x64xbf16, #tpu.memory_space<vmem>>, %arg5: memref<1x64xf32, #tpu.memory_space<vmem>>, %arg6: memref<64x2xbf16, #tpu.memory_space<vmem>>, %arg7: memref<1x2xf32, #tpu.memory_space<vmem>>, %arg8: memref<2x64xf32, #tpu.memory_space<vmem>>, %arg9: memref<2x2xf32, #tpu.memory_space<vmem>>) attributes {dimension_semantics = [#tpu.dimension_semantics<arbitrary>], iteration_bounds = array<i64: 1>, scalar_prefetch = 0 : i64, scratch_operands = 0 : i64, tpu.core_type = #tpu.core_type<tc>, window_params = [{pipeline_mode = #tpu.pipeline_mode<synchronous>, transform_indices = @transform_0, window_bounds = array<i64: 2, 64>}, {pipeline_mode = #tpu.pipeline_mode<synchronous>, transform_indices = @transform_1, window_bounds = array<i64: 64, 64>}, {pipeline_mode = #tpu.pipeline_mode<synchronous>, transform_indices = @transform_2, window_bounds = array<i64: 1, 64>}, {pipeline_mode = #tpu.pipeline_mode<synchronous>, transform_indices = @transform_3, window_bounds = array<i64: 64, 64>}, {pipeline_mode = #tpu.pipeline_mode<synchronous>, transform_indices = @transform_4, window_bounds = array<i64: 1, 64>}, {pipeline_mode = #tpu.pipeline_mode<synchronous>, transform_indices = @transform_5, window_bounds = array<i64: 64, 2>}, {pipeline_mode = #tpu.pipeline_mode<synchronous>, transform_indices = @transform_6, window_bounds = array<i64: 1, 2>}, {pipeline_mode = #tpu.pipeline_mode<synchronous>, transform_indices = @transform_7, window_bounds = array<i64: 2, 64>}, {pipeline_mode = #tpu.pipeline_mode<synchronous>, transform_indices = @transform_8, window_bounds = array<i64: 2, 2>}]} {
    %c0 = arith.constant 0 : index
    %c0_0 = arith.constant 0 : index
    %0 = vector.load %arg1[%c0, %c0_0] : memref<2x64xbf16, #tpu.memory_space<vmem>>, vector<2x64xbf16>
    %c0_1 = arith.constant 0 : index
    %c0_2 = arith.constant 0 : index
    %1 = vector.load %arg2[%c0_1, %c0_2] : memref<64x64xbf16, #tpu.memory_space<vmem>>, vector<64x64xbf16>
    %cst = arith.constant dense<0.000000e+00> : vector<2x64xf32>
    %2 = tpu.matmul %0, %1, %cst {dimension_numbers = #tpu.dot_dimension_numbers<[1], [0], [0], [1], [0, 0, 1, 1], [], []>} : vector<2x64xbf16>, vector<64x64xbf16>, vector<2x64xf32> -> vector<2x64xf32>
    %c0_3 = arith.constant 0 : index
    %c0_4 = arith.constant 0 : index
    %3 = vector.load %arg3[%c0_3, %c0_4] : memref<1x64xf32, #tpu.memory_space<vmem>>, vector<1x64xf32>
    %4 = vector.broadcast %3 : vector<1x64xf32> to vector<2x64xf32>
    %5 = arith.addf %2, %4 : vector<2x64xf32>
    %6 = math.tanh %5 : vector<2x64xf32>
    %c0_5 = arith.constant 0 : index
    %c0_6 = arith.constant 0 : index
    %7 = vector.load %arg8[%c0_5, %c0_6] : memref<2x64xf32, #tpu.memory_space<vmem>>, vector<2x64xf32>
    tpu.vector_store %arg8[%c0_5, %c0_6], %6 {strides = array<i32>} : memref<2x64xf32, #tpu.memory_space<vmem>>, vector<2x64xf32>,
    %8 = arith.truncf %6 : vector<2x64xf32> to vector<2x64xbf16>
    %c0_7 = arith.constant 0 : index
    %c0_8 = arith.constant 0 : index
    %9 = vector.load %arg4[%c0_7, %c0_8] : memref<64x64xbf16, #tpu.memory_space<vmem>>, vector<64x64xbf16>
    %cst_9 = arith.constant dense<0.000000e+00> : vector<2x64xf32>
    %10 = tpu.matmul %8, %9, %cst_9 {dimension_numbers = #tpu.dot_dimension_numbers<[1], [0], [0], [1], [0, 0, 1, 1], [], []>} : vector<2x64xbf16>, vector<64x64xbf16>, vector<2x64xf32> -> vector<2x64xf32>
    %c0_10 = arith.constant 0 : index
    %c0_11 = arith.constant 0 : index
    %11 = vector.load %arg5[%c0_10, %c0_11] : memref<1x64xf32, #tpu.memory_space<vmem>>, vector<1x64xf32>
    %12 = vector.broadcast %11 : vector<1x64xf32> to vector<2x64xf32>
    %13 = arith.addf %10, %12 : vector<2x64xf32>
    %14 = math.tanh %13 : vector<2x64xf32>
    %15 = arith.truncf %14 : vector<2x64xf32> to vector<2x64xbf16>
    %c0_12 = arith.constant 0 : index
    %c0_13 = arith.constant 0 : index
    %16 = vector.load %arg6[%c0_12, %c0_13] : memref<64x2xbf16, #tpu.memory_space<vmem>>, vector<64x2xbf16>
    %cst_14 = arith.constant dense<0.000000e+00> : vector<2x2xf32>
    %17 = tpu.matmul %15, %16, %cst_14 {dimension_numbers = #tpu.dot_dimension_numbers<[1], [0], [0], [1], [0, 0, 1, 1], [], []>} : vector<2x64xbf16>, vector<64x2xbf16>, vector<2x2xf32> -> vector<2x2xf32>
    %c0_15 = arith.constant 0 : index
    %c0_16 = arith.constant 0 : index
    %18 = vector.load %arg7[%c0_15, %c0_16] : memref<1x2xf32, #tpu.memory_space<vmem>>, vector<1x2xf32>
    %19 = vector.broadcast %18 : vector<1x2xf32> to vector<2x2xf32>
    %20 = arith.addf %17, %19 : vector<2x2xf32>
    %c0_17 = arith.constant 0 : index
    %c0_18 = arith.constant 0 : index
    %21 = vector.load %arg9[%c0_17, %c0_18] : memref<2x2xf32, #tpu.memory_space<vmem>>, vector<2x2xf32>
    tpu.vector_store %arg9[%c0_17, %c0_18], %20 {strides = array<i32>} : memref<2x2xf32, #tpu.memory_space<vmem>>, vector<2x2xf32>,
    return
  }
  func.func @transform_0(%arg0: i32) -> (i32, i32) {
    %c0_i32 = arith.constant 0 : i32
    %c0_i32_0 = arith.constant 0 : i32
    %c0_i32_1 = arith.constant 0 : i32
    return %c0_i32, %c0_i32_0 : i32, i32
  }
  func.func @transform_1(%arg0: i32) -> (i32, i32) {
    %c0_i32 = arith.constant 0 : i32
    %c0_i32_0 = arith.constant 0 : i32
    %c0_i32_1 = arith.constant 0 : i32
    return %c0_i32, %c0_i32_0 : i32, i32
  }
  func.func @transform_2(%arg0: i32) -> (i32, i32) {
    %c0_i32 = arith.constant 0 : i32
    %c0_i32_0 = arith.constant 0 : i32
    %c0_i32_1 = arith.constant 0 : i32
    return %c0_i32, %c0_i32_0 : i32, i32
  }
  func.func @transform_3(%arg0: i32) -> (i32, i32) {
    %c0_i32 = arith.constant 0 : i32
    %c0_i32_0 = arith.constant 0 : i32
    %c0_i32_1 = arith.constant 0 : i32
    return %c0_i32, %c0_i32_0 : i32, i32
  }
  func.func @transform_4(%arg0: i32) -> (i32, i32) {
    %c0_i32 = arith.constant 0 : i32
    %c0_i32_0 = arith.constant 0 : i32
    %c0_i32_1 = arith.constant 0 : i32
    return %c0_i32, %c0_i32_0 : i32, i32
  }
  func.func @transform_5(%arg0: i32) -> (i32, i32) {
    %c0_i32 = arith.constant 0 : i32
    %c0_i32_0 = arith.constant 0 : i32
    %c0_i32_1 = arith.constant 0 : i32
    return %c0_i32, %c0_i32_0 : i32, i32
  }
  func.func @transform_6(%arg0: i32) -> (i32, i32) {
    %c0_i32 = arith.constant 0 : i32
    %c0_i32_0 = arith.constant 0 : i32
    %c0_i32_1 = arith.constant 0 : i32
    return %c0_i32, %c0_i32_0 : i32, i32
  }
  func.func @transform_7(%arg0: i32) -> (i32, i32) {
    %c0_i32 = arith.constant 0 : i32
    %c0_i32_0 = arith.constant 0 : i32
    %c0_i32_1 = arith.constant 0 : i32
    return %c0_i32, %c0_i32_0 : i32, i32
  }
  func.func @transform_8(%arg0: i32) -> (i32, i32) {
    %c0_i32 = arith.constant 0 : i32
    %c0_i32_0 = arith.constant 0 : i32
    %c0_i32_1 = arith.constant 0 : i32
    return %c0_i32, %c0_i32_0 : i32, i32
  }
}

</mosaic_0001>

<bundles_post_ra>
// kernel: torch_bert_forward.14
= control target key start
LH: loop header
LB: loop body
LE: loop exit
PB: predicated region body
PF: predicated region fallthrough
CT: control target
= control target key end

     0   :  { %s404_s18 = smov 0   ;;  %s438_s0 = inlined_call_operand.vmem [shape: bf16[16,64], index: 0, kind: input, shape index: {}]   ;;  %s439_s1 = inlined_call_operand.vmem [shape: bf16[16,64], index: 1, kind: input, shape index: {}]   ;;  %s440_s2 = inlined_call_operand.vmem [shape: bf16[8,64], index: 2, kind: input, shape index: {}]   ;;  %s441_s3 = inlined_call_operand.vmem [shape: f32[1,64], index: 3, kind: input, shape index: {}]   ;;  %s442_s4 = inlined_call_operand.vmem [shape: f32[1,64], index: 4, kind: input, shape index: {}]   ;;  %s443_s5 = inlined_call_operand.vmem [shape: bf16[16,64], index: 5, kind: output, shape index: {}]  }
   0x1 LB: > { %s344_s19 = sadd.s32 4294967295, %s372_s18   ;;  %p348_p0 = scmp.ge.s32.totalorder %s372_s18, 1  ;;  %s372_s18 = sphi %s404_s18, %s15_s18  }
   0x2   : > { %p195_p1 = scmp.lt.s32.totalorder %s372_s18, 3 }
   0x4   : > { %p196_p2 = pnand %p348_p0, %p195_p1 }
   0x5   : > { %p225_p3 = scmp.lt.s32.totalorder (!%p196_p2), %s344_s19, 1  ;;  %v242_v0 = vld [vmem:[%s440_s2] sm:$0xf] (!%p196_p2)  ;;  %vm245_vm0 = vcmask (!%p196_p2), 523264   ;;  %vm277_vm1 = vcmask (!%p196_p2), 519168  }
   0x6   : > { %199 = sbr.rel (%p196_p2) target bundleno = 340 (0x154), region = 40  ;;  %v243_v5 = vunpack.c.l.bf16 (!%p196_p2), %v242_v0  ;;  %v352_v18 = vld [vmem:[%s441_s3] ss:$0 sm:$0xff] (!%p196_p2) }
   0x7   : > { %v353_v20 = vld [vmem:[%s442_s4] ss:$0 sm:$0xff] (!%p196_p2) }
   0xd   : > { %s445_s19 = smov (!%p225_p3, %s344_s19), 1 }
   0xe   : > { %s412_s20 = sshll.u32 %s445_s19, 2 }
   0xf   : > { %s228_s25 = scalar_lea.vmem %s438_s0, %s412_s20  ;;  %s232_s28 = scalar_lea.vmem %s439_s1, %s412_s20 }
  0x10   : > { %v237_v1 = vld [vmem:[%s228_s25] sm:$0xf]  ;;  %s236_s10 = scalar_lea.vmem %s443_s5, %s412_s20 }
  0x11   : > { %v239_v2 = vld [vmem:[%s232_s28] sm:$0xf]  ;;  %v238_v3 = vunpack.c.l.bf16 %v237_v1 }
  0x12   : > { %v240_v4 = vunpack.c.l.bf16 %v239_v2 }
  0x14   : > { %v241_v6 = vadd.f32 %v240_v4, %v238_v3 }
  0x16   : > { %v244_v7 = vadd.f32 %v243_v5, %v241_v6 }
  0x18   : > { %v246_v8 = vsel %vm245_vm0, %v244_v7, 0.0 }
  0x19   : > { %247 = vadd.xlane.f32.xlu0 %v246_v8 }
  0xa6   : > { %v248_v9 = vpop.xlane.xlu0 %247 }
  0xa7   : > { %v250_v10 = vmul.f32 0.015625, %v248_v9 }
  0xa9   : > { %v251_v11 = vsub.f32 %v244_v7, %v250_v10 }
  0xab   : > { %v252_v12 = vmul.f32 %v251_v11, %v251_v11 }
  0xad   : > { %v253_v13 = vsel %vm245_vm0, %v252_v12, 0.0 }
  0xae   : > { %254 = vadd.xlane.f32.xlu0 %v253_v13 }
 0x13b   : > { %v255_v14 = vpop.xlane.xlu0 %254 }
 0x13c   : > { %v256_v15 = vmul.f32 0.015625, %v255_v14 }
 0x13e   : > { %v257_v16 = vadd.f32 1e-12, %v256_v15 }
 0x140   : > { %364 = vrsqrt.f32 %v257_v16 }
 0x14a   : > { %v365_v17 = vpop.eup %364 }
 0x14b   : > { %v259_v19 = vmul.f32 %v365_v17, %v251_v11 }
 0x14d   : > { %v267_v21 = vmul.f32 %v352_v18, %v259_v19 }
 0x14f   : > { %v275_v22 = vadd.f32 %v353_v20, %v267_v21 }
 0x151   : > { %v276_v23 = vpack.c.bf16 %v275_v22, %v275_v22 }
 0x153   : > { %278 = vst.msk [vmem:[%s236_s10] sm:$0xf] %vm277_vm1, %v276_v23 }
 0x154 PF: > { %s15_s18 = sadd.s32 1, %s372_s18  }
 0x155   : > { %p12_p4 = scmp.ge.s32.totalorder %s15_s18, 4  }
 0x157   :  { %14 = sbr.rel (!%p12_p4) target bundleno = 1 (0x1), region = 73 }

// kernel: torch_bert_forward.15
= control target key start
LH: loop header
LB: loop body
LE: loop exit
PB: predicated region body
PF: predicated region fallthrough
CT: control target
= control target key end

     0   :  { %vm20_vm0 = vcmask 523264   ;;  %v211_v1 = vmov 0   ;;  %v212_v2 = vmov 0.0   ;;  %v147_v11 = vlaneseq  ;;  %s274_s1 = inlined_call_operand.vmem [shape: bf16[64,192], index: 1, kind: input, shape index: {}]   ;;  %s275_s0 = inlined_call_operand.vmem [shape: bf16[16,64], index: 0, kind: input, shape index: {}]   ;;  %s276_s2 = inlined_call_operand.vmem [shape: f32[1,192], index: 2, kind: input, shape index: {}]   ;;  %s277_s3 = inlined_call_operand.vmem [shape: bf16[16,192], index: 3, kind: output, shape index: {}]  }
   0x1   :  { %v198_v0 = vld [vmem:[%s274_s1 + $0x4] ss:$8 sps:$4 sm:$0xff]   ;;  %119 = vmatprep.mubr.bf16.mxu0 %v211_v1  ;;  %21 = vst.msk [vmem:[#allocation2 + $0x8] sm:$0xff] %vm20_vm0, %v212_v2  ;;  %23 = vst.msk [vmem:[#allocation2 + $0x18] sm:$0xff] %vm20_vm0, %v212_v2  ;;  %v200_v3 = vld [vmem:[%s274_s1] ss:$8 sps:$4 sm:$0xff]  }
   0x2   :  { %87 = vmatprep.subr.bf16.mxu0 %v198_v0  ;;  %v201_v4 = vld [vmem:[%s274_s1 + $0x14] ss:$8 sps:$4 sm:$0xff]   ;;  %v203_v5 = vld [vmem:[%s274_s1 + $0x10] ss:$8 sps:$4 sm:$0xff]   ;;  %v204_v6 = vld [vmem:[%s274_s1 + $0x24] ss:$8 sps:$4 sm:$0xff]  }
   0x3   :  { %88 = vmatpush1.bf16.msra.mxu0 %v200_v3  ;;  %v206_v7 = vld [vmem:[%s274_s1 + $0x20] ss:$8 sps:$4 sm:$0xff]   ;;  %v207_v8 = vld [vmem:[%s274_s1 + $0x34] ss:$8 sps:$4 sm:$0xff]   ;;  %v209_v9 = vld [vmem:[%s274_s1 + $0x30] ss:$8 sps:$4 sm:$0xff]  }
   0x4   :  { %89 = vmatprep.subr.bf16.mxu0 %v201_v4  ;;  %v210_v10 = vld [vmem:[%s275_s0] sm:$0xff]   ;;  %v148_v14 = vshrl.u32 %v147_v11, 7  ;;  %vm173_vm1 = vcmask 1043456   ;;  %vm174_vm2 = vcmask 523268  }
   0x5   :  { %v145_v23 = vld [vmem:[%s276_s2] sm:$0x3]  ;;  %vm175_vm3 = vmor %vm174_vm2, %vm173_vm1 }
   0x6   :  { %v149_v20 = vsub.s32 0, %v148_v14  ;;  %v153_v21 = vsub.s32 1, %v148_v14 }
   0x7   :  { %90 = vmatpush1.bf16.msra.mxu0 %v203_v5 }
   0x8   :  { %91 = vmatprep.subr.bf16.mxu0 %v204_v6  ;;  %v25_v12 = vld [vmem:[#allocation2 + $0x8] sm:$0xff]  ;;  %v27_v16 = vld [vmem:[#allocation2 + $0x18] sm:$0xff]  ;;  %v150_v24 = vrot.slane %v145_v23, %v149_v20  ;;  %v154_v25 = vrot.slane %v145_v23, %v153_v21 }
   0xb   :  { %92 = vmatpush1.bf16.msra.mxu0 %v206_v7 }
   0xc   :  { %93 = vmatprep.subr.bf16.mxu0 %v207_v8 }
   0xf   :  { %94 = vmatpush1.bf16.msra.mxu0 %v209_v9 }
  0x12   :  { %191 = vmatmul.mubr.msk.bf16.vlgmr.msra.gmra.mrb[0].mxu0 %vm20_vm0, %v210_v10 }
  0xe5   :  { %v121_v13 = vpop.f32.mrb[0].mxu0 }
  0xe6   :  { %v123_v15 = vpop.f32.mrb[1].mxu0  ;;  %v157_v27 = vadd.f32 %v150_v24, %v121_v13 }
  0xe7   :  { %v131_v17 = vadd.f32 %v123_v15, %v25_v12  ;;  %v125_v18 = vpop.f32.mrb[2].mxu0 }
  0xe8   :  { %v127_v19 = vpop.f32.mrb[3].mxu0  ;;  %v159_v31 = vadd.f32 %v150_v24, %v125_v18 }
  0xe9   :  { %135 = vst.msk [vmem:[#allocation2 + $0x8] sm:$0xff] %vm20_vm0, %v131_v17  ;;  %v133_v22 = vadd.f32 %v127_v19, %v27_v16 }
  0xeb   :  { %137 = vst.msk [vmem:[#allocation2 + $0x18] sm:$0xff] %vm20_vm0, %v133_v22 }
  0xf0   :  { %v142_v26 = vld [vmem:[#allocation2 + $0x8] sm:$0xff] }
  0xf1   :  { %v158_v28 = vadd.f32 %v154_v25, %v142_v26 }
  0xf2   :  { %v144_v29 = vld [vmem:[#allocation2 + $0x18] sm:$0xff] }
  0xf3   :  { %v194_v30 = vpack.c.bf16 %v158_v28, %v157_v27  ;;  %v160_v32 = vadd.f32 %v154_v25, %v144_v29 }
  0xf5   :  { %176 = vst.msk [vmem:[%s277_s3] sm:$0xff] %vm175_vm3, %v194_v30  ;;  %v195_v33 = vpack.c.bf16 %v160_v32, %v159_v31 }
  0xf7   :  { %177 = vst.msk [vmem:[%s277_s3 + $0x8] sm:$0xff] %vm175_vm3, %v195_v33 }

// kernel: torch_bert_forward.16
= control target key start
LH: loop header
LB: loop body
LE: loop exit
PB: predicated region body
PF: predicated region fallthrough
CT: control target
= control target key end

     0   :  { %s569_s9 = smov 0   ;;  %s613_s0 = inlined_call_operand.vmem [shape: bf16[16,192], index: 0, kind: input, shape index: {}]   ;;  %s614_s1 = inlined_call_operand.vmem [shape: f32[2,1,8], index: 1, kind: input, shape index: {}]   ;;  %s615_s2 = inlined_call_operand.vmem [shape: bf16[16,64], index: 2, kind: output, shape index: {}]  }
   0x1 LB: > { %s467_s10 = sadd.s32 4294967295, %s547_s9   ;;  %p471_p0 = scmp.ge.s32.totalorder %s547_s9, 1  ;;  %s547_s9 = sphi %s569_s9, %s12_s9  }
   0x2   : > { %p120_p1 = scmp.lt.s32.totalorder %s547_s9, 3 }
   0x4   : > { %p121_p2 = pnand %p471_p0, %p120_p1 }
   0x5   : > { %p144_p3 = scmp.lt.s32.totalorder (!%p121_p2), %s467_s10, 1  ;;  %v549_v0 = vmov (!%p121_p2), 0.0   ;;  %vm550_vm0 = vmmov (!%p121_p2), 0   ;;  %s551_s15 = smov (!%p121_p2), 64   ;;  %vm172_vm1 = vcmask (!%p121_p2), 261120   ;;  %vm219_vm2 = vcmask (!%p121_p2), 64512  }
   0x6   : > { %124 = sbr.rel (%p121_p2) target bundleno = 1238 (0x4d6), region = 28  ;;  %494 = vmatprep.subr.bf16.mxu0 (!%p121_p2), %v549_v0  ;;  %496 = vmatprep.mubr.msk.bf16.mxu0 (!%p121_p2), %vm550_vm0, %v549_v0  ;;  %s552_s16 = smov (!%p121_p2), 32   ;;  %vm236_vm3 = vcmask (!%p121_p2), 1043456   ;;  %vm399_vm4 = vcmask (!%p121_p2), 523520   ;;  %vm403_vm5 = vcmask (!%p121_p2), 519168  }
   0x7   : > { %500 = vmatprep.subr.bf16.mxu1 (!%p121_p2), %v549_v0  ;;  %502 = vmatprep.mubr.msk.bf16.mxu1 (!%p121_p2), %vm550_vm0, %v549_v0  ;;  %s553_s17 = smov (!%p121_p2), 96  }
   0xd   : > { %s617_s10 = smov (!%p144_p3, %s467_s10), 1 }
   0xe   : > { %s485_s11 = sshll.u32 %s617_s10, 3  ;;  %s151_s20 = scalar_lea.vmem %s614_s1, %s617_s10 }
   0xf   : > { %s148_s14 = scalar_lea.vmem %s613_s0, %s485_s11  ;;  %v475_v7 = vld [vmem:[%s151_s20] ss:$0 sm:$0xff]  ;;  %s474_s21 = sshll.u32 %s617_s10, 2 }
  0x10   : > { %v158_v1 = vld [vmem:[%s148_s14] sm:$0xff]  ;;  %s155_s24 = scalar_lea.vmem %s615_s2, %s474_s21 }
  0x11   : > { %v476_v2 = vcombine.low %v158_v1, %v158_v1  ;;  %v160_v5 = vmul.bf16 1043676725, %v158_v1  ;;  %v478_v14 = vcombine.high %v158_v1, %v158_v1 }
  0x13   : > { %170 = vrot.lane.b32.xlu0 %v476_v2, %s551_s15  ;;  %287 = vrot.lane.b32.xlu1 %v476_v2, %s552_s16  ;;  %v480_v6 = vcombine.low %v160_v5, %v160_v5  ;;  %v238_v15 = vsel %vm236_vm3, %v478_v14, 0 }
  0x14   : > { %501 = vmatpush3.bf16.msra.mxu1 %v238_v15 }
  0x15   : > { %506 = vmatprep.subr.bf16.mxu1 %v549_v0 }
  0x17   : > { %285 = vrot.lane.b32.xlu1 %v480_v6, %s553_s17 }
  0x85   : > { %v171_v3 = vpop.permute.xlu0 %170  ;;  %v288_v19 = vpop.permute.xlu1 %287 }
  0x86   : > { %v177_v4 = vsel %vm172_vm1, %v171_v3, 0  ;;  %v293_v21 = vsel %vm172_vm1, %v288_v19, 0 }
  0x87   : > { %495 = vmatpush3.bf16.xpose.msra.mxu0 %v177_v4 }
  0x88   : > { %512 = vmatprep.subr.bf16.mxu0 %v549_v0 }
  0x89   : > { %v286_v23 = vpop.permute.xlu1 %285 }
  0x8e   : > { %497 = vmatmul.mubr.msk.bf16.vlgmr.msra.gmra.mrb[0].mxu0 %vm172_vm1, %v160_v5 }
  0x8f   : > { %514 = vmatprep.mubr.msk.bf16.mxu0 %vm550_vm0, %v549_v0 }
 0x161   : > { %v213_v8 = vpop.f32.mrb[0].mxu0 }
 0x162   : > { %v214_v9 = vadd.f32 %v475_v7, %v213_v8  ;;  %v498_v10 = vpop.f32.mrb[1].mxu0 }
 0x163   : > { %v216_v11 = vpop.f32.mrb[2].mxu0 }
 0x164   : > { %v499_v12 = vpop.f32.mrb[3].mxu0  ;;  %v220_v13 = vsel %vm219_vm2, %v214_v9, -inf }
 0x165   : > { %221 = vmax.xlane.f32.xlu0 %v220_v13 }
 0x17b   : > { %346 = vrot.lane.b32.xlu0 %v478_v14, %s553_s17 }
 0x1f2   : > { %v222_v16 = vpop.xlane.xlu0 %221 }
 0x1f3   : > { %v223_v17 = vsub.f32 %v214_v9, %v222_v16 }
 0x1f5   : > { %v224_v18 = vmul.f32 1.442695, %v223_v17 }
 0x1f6   : > { %v347_v34 = vpop.permute.xlu0 %346 }
 0x1f7   : > { %533 = vpow2.f32 %v224_v18  ;;  %v352_v35 = vsel %vm236_vm3, %v347_v34, 0 }
 0x1f8   : > { %513 = vmatpush3.bf16.msra.mxu0 %v352_v35 }
 0x201   : > { %v534_v20 = vpop.eup %533 }
 0x202   : > { %v230_v22 = vpack.c.bf16 %v534_v20, %v534_v20  ;;  %v226_v42 = vsel %vm219_vm2, %v534_v20, 0.0 }
 0x204   : > { %503 = vmatmul.mubr.msk.bf16.vlgmr.msra.gmra.mrb[0].mxu1 %vm219_vm2, %v230_v22 }
 0x205   : > { %507 = vmatpush3.bf16.xpose.msra.mxu1 %v293_v21  ;;  %508 = vmatprep.mubr.msk.bf16.mxu1 %vm550_vm0, %v549_v0 }
 0x20c   : > { %509 = vmatmul.mubr.msk.bf16.vlgmr.msra.gmra.mrb[4].mxu1 %vm172_vm1, %v286_v23 }
 0x2d7   : > { %v274_v24 = vpop.f32.mrb[0].mxu1 }
 0x2d8   : > { %v504_v25 = vpop.f32.mrb[1].mxu1 }
 0x2d9   : > { %v277_v26 = vpop.f32.mrb[2].mxu1 }
 0x2da   : > { %v505_v27 = vpop.f32.mrb[3].mxu1 }
 0x2df   : > { %v329_v28 = vpop.f32.mrb[4].mxu1 }
 0x2e0   : > { %v330_v29 = vadd.f32 %v475_v7, %v329_v28  ;;  %v510_v30 = vpop.f32.mrb[5].mxu1 }
 0x2e1   : > { %v332_v31 = vpop.f32.mrb[6].mxu1 }
 0x2e2   : > { %v511_v32 = vpop.f32.mrb[7].mxu1  ;;  %v335_v33 = vsel %vm219_vm2, %v330_v29, -inf }
 0x2e3   : > { %336 = vmax.xlane.f32.xlu1 %v335_v33 }
 0x370   : > { %v337_v36 = vpop.xlane.xlu1 %336 }
 0x371   : > { %v338_v37 = vsub.f32 %v330_v29, %v337_v36 }
 0x373   : > { %v339_v38 = vmul.f32 1.442695, %v338_v37 }
 0x375   : > { %535 = vpow2.f32 %v339_v38 }
 0x37f   : > { %v536_v39 = vpop.eup %535 }
 0x380   : > { %v341_v40 = vsel %vm219_vm2, %v536_v39, 0.0  ;;  %v345_v41 = vpack.c.bf16 %v536_v39, %v536_v39 }
 0x381   : > { %342 = vadd.xlane.f32.xlu1 %v341_v40 }
 0x382   : > { %515 = vmatmul.mubr.msk.bf16.vlgmr.msra.gmra.mrb[4].mxu0 %vm219_vm2, %v345_v41 }
 0x385   : > { %227 = vadd.xlane.f32.xlu1 %v226_v42 }
 0x40e   : > { %v343_v43 = vpop.xlane.xlu1 %342 }
 0x412   : > { %v228_v44 = vpop.xlane.xlu1 %227 }
 0x413   : > { %537 = vrcp.f32 %v228_v44 }
 0x414   : > { %539 = vrcp.f32 %v343_v43 }
 0x41d   : > { %v538_v45 = vpop.eup %537 }
 0x41e   : > { %v280_v46 = vmul.f32 %v538_v45, %v274_v24  ;;  %v540_v47 = vpop.eup %539 }
 0x420   : > { %281 = vst.msk [vmem:[#allocation2] sm:$0xff] %vm172_vm1, %v280_v46 }
 0x455   : > { %v388_v48 = vpop.f32.mrb[4].mxu0 }
 0x456   : > { %v394_v49 = vmul.f32 %v540_v47, %v388_v48  ;;  %v516_v50 = vpop.f32.mrb[5].mxu0 }
 0x457   : > { %v391_v51 = vpop.f32.mrb[6].mxu0 }
 0x458   : > { %396 = vrot.lane.b32.xlu1 %v394_v49, %s552_s16  ;;  %v517_v52 = vpop.f32.mrb[7].mxu0 }
 0x4ca   : > { %v397_v53 = vpop.permute.xlu1 %396 }
 0x4cb   : > { %400 = vst.msk [vmem:[#allocation2] sm:$0xff] %vm399_vm4, %v397_v53 }
 0x4d2   : > { %v401_v54 = vld [vmem:[#allocation2] sm:$0xff] }
 0x4d3   : > { %v402_v55 = vpack.c.bf16 %v401_v54, %v401_v54 }
 0x4d5   : > { %404 = vst.msk [vmem:[%s155_s24] sm:$0xf] %vm403_vm5, %v402_v55 }
 0x4d6 PF: > { %s12_s9 = sadd.s32 1, %s547_s9  }
 0x4d7   : > { %p9_p4 = scmp.ge.s32.totalorder %s12_s9, 4  }
 0x4d9   :  { %11 = sbr.rel (!%p9_p4) target bundleno = 1 (0x1), region = 61 }

// kernel: torch_bert_forward.17
= control target key start
LH: loop header
LB: loop body
LE: loop exit
PB: predicated region body
PF: predicated region fallthrough
CT: control target
= control target key end

     0   :  { %vm28_vm0 = vcmask 523264   ;;  %v246_v0 = vmov 0.0   ;;  %vm247_vm1 = vmmov 0   ;;  %vm194_vm2 = vcmask 519168   ;;  %s325_s1 = inlined_call_operand.vmem [shape: bf16[64,64], index: 1, kind: input, shape index: {}]   ;;  %s326_s0 = inlined_call_operand.vmem [shape: bf16[16,64], index: 0, kind: input, shape index: {}]   ;;  %s327_s3 = inlined_call_operand.vmem [shape: bf16[16,64], index: 3, kind: input, shape index: {}]   ;;  %s328_s2 = inlined_call_operand.vmem [shape: f32[1,64], index: 2, kind: input, shape index: {}]   ;;  %s329_s4 = inlined_call_operand.vmem [shape: f32[1,64], index: 4, kind: input, shape index: {}]   ;;  %s330_s5 = inlined_call_operand.vmem [shape: f32[1,64], index: 5, kind: input, shape index: {}]   ;;  %s331_s6 = inlined_call_operand.vmem [shape: bf16[16,64], index: 6, kind: output, shape index: {}]  }
   0x1   :  { %223 = vmatprep.subr.bf16.mxu0 %v246_v0  ;;  %v237_v1 = vld [vmem:[%s325_s1] sm:$0xff]   ;;  %231 = vmatprep.mubr.msk.bf16.mxu0 %vm247_vm1, %v246_v0  ;;  %29 = vst.msk [vmem:[#allocation2] sm:$0xff] %vm28_vm0, %v246_v0  ;;  %30 = vst.msk [vmem:[#allocation2 + $0x8] sm:$0xff] %vm28_vm0, %v246_v0  ;;  %v238_v2 = vld [vmem:[%s325_s1 + $0x8] sm:$0xff]  }
   0x2   :  { %224 = vmatpush3.bf16.msra.mxu0 %v237_v1  ;;  %v239_v3 = vld [vmem:[%s325_s1 + $0x10] sm:$0xff]   ;;  %v240_v4 = vld [vmem:[%s325_s1 + $0x18] sm:$0xff]   ;;  %v241_v5 = vld [vmem:[%s326_s0] sm:$0xff]  }
   0x3   :  { %225 = vmatprep.subr.bf16.mxu0 %v246_v0  ;;  %v215_v14 = vld [vmem:[%s327_s3] sm:$0xff]  }
   0x4   :  { %v207_v15 = vld [vmem:[%s328_s2] ss:$0 sm:$0xff]  ;;  %v216_v16 = vunpack.c.l.bf16 %v215_v14  ;;  %v217_v19 = vunpack.c.h.bf16 %v215_v14 }
   0x5   :  { %v208_v43 = vld [vmem:[%s329_s4] ss:$0 sm:$0xff] }
   0x6   :  { %226 = vmatpush3.bf16.msra.mxu0 %v238_v2  ;;  %v209_v45 = vld [vmem:[%s330_s5] ss:$0 sm:$0xff] }
   0x7   :  { %227 = vmatprep.subr.bf16.mxu0 %v246_v0 }
   0x8   :  { %v31_v6 = vld [vmem:[#allocation2] sm:$0xff]  ;;  %v32_v8 = vld [vmem:[#allocation2 + $0x8] sm:$0xff] }
   0xa   :  { %228 = vmatpush3.bf16.msra.mxu0 %v239_v3 }
   0xb   :  { %229 = vmatprep.subr.bf16.mxu0 %v246_v0 }
   0xe   :  { %230 = vmatpush3.bf16.msra.mxu0 %v240_v4 }
  0x11   :  { %232 = vmatmul.mubr.msk.bf16.vlgmr.msra.gmra.mrb[0].mxu0 %vm28_vm0, %v241_v5 }
  0xe4   :  { %v110_v7 = vpop.f32.mrb[0].mxu0 }
  0xe5   :  { %v117_v9 = vadd.f32 %v110_v7, %v31_v6  ;;  %v233_v10 = vpop.f32.mrb[1].mxu0 }
  0xe6   :  { %v113_v11 = vpop.f32.mrb[2].mxu0 }
  0xe7   :  { %119 = vst.msk [vmem:[#allocation2] sm:$0xff] %vm28_vm0, %v117_v9  ;;  %v118_v12 = vadd.f32 %v113_v11, %v32_v8  ;;  %v234_v13 = vpop.f32.mrb[3].mxu0 }
  0xe9   :  { %120 = vst.msk [vmem:[#allocation2 + $0x8] sm:$0xff] %vm28_vm0, %v118_v12 }
  0xee   :  { %v124_v17 = vld [vmem:[#allocation2] sm:$0xff] }
  0xef   :  { %v133_v18 = vadd.f32 %v207_v15, %v124_v17 }
  0xf0   :  { %v125_v20 = vld [vmem:[#allocation2 + $0x8] sm:$0xff] }
  0xf1   :  { %v139_v21 = vadd.f32 %v216_v16, %v133_v18  ;;  %v134_v22 = vadd.f32 %v207_v15, %v125_v20 }
  0xf3   :  { %v141_v23 = vsel %vm28_vm0, %v139_v21, 0.0  ;;  %v140_v24 = vadd.f32 %v217_v19, %v134_v22 }
  0xf4   :  { %142 = vadd.xlane.f32.xlu0 %v141_v23 }
  0xf5   :  { %v144_v25 = vsel %vm28_vm0, %v140_v24, 0.0 }
  0xf8   :  { %145 = vadd.xlane.f32.xlu0 %v144_v25 }
 0x181   :  { %v143_v26 = vpop.xlane.xlu0 %142 }
 0x182   :  { %v148_v27 = vmul.f32 0.015625, %v143_v26 }
 0x184   :  { %v150_v28 = vsub.f32 %v139_v21, %v148_v27 }
 0x185   :  { %v146_v29 = vpop.xlane.xlu0 %145 }
 0x186   :  { %v149_v30 = vmul.f32 0.015625, %v146_v29  ;;  %v152_v31 = vmul.f32 %v150_v28, %v150_v28 }
 0x188   :  { %v151_v32 = vsub.f32 %v140_v24, %v149_v30  ;;  %v154_v33 = vsel %vm28_vm0, %v152_v31, 0.0 }
 0x189   :  { %155 = vadd.xlane.f32.xlu1 %v154_v33 }
 0x18a   :  { %v153_v34 = vmul.f32 %v151_v32, %v151_v32 }
 0x18c   :  { %v157_v35 = vsel %vm28_vm0, %v153_v34, 0.0 }
 0x18d   :  { %158 = vadd.xlane.f32.xlu1 %v157_v35 }
 0x216   :  { %v156_v36 = vpop.xlane.xlu1 %155 }
 0x217   :  { %v160_v37 = vmul.f32 0.015625, %v156_v36 }
 0x219   :  { %v162_v38 = vadd.f32 1e-12, %v160_v37 }
 0x21a   :  { %v159_v39 = vpop.xlane.xlu1 %158 }
 0x21b   :  { %242 = vrsqrt.f32 %v162_v38  ;;  %v161_v40 = vmul.f32 0.015625, %v159_v39 }
 0x21d   :  { %v163_v41 = vadd.f32 1e-12, %v161_v40 }
 0x21f   :  { %244 = vrsqrt.f32 %v163_v41 }
 0x225   :  { %v243_v42 = vpop.eup %242 }
 0x226   :  { %v166_v44 = vmul.f32 %v243_v42, %v150_v28 }
 0x228   :  { %v175_v46 = vmul.f32 %v208_v43, %v166_v44 }
 0x229   :  { %v245_v47 = vpop.eup %244 }
 0x22a   :  { %v184_v48 = vadd.f32 %v209_v45, %v175_v46  ;;  %v167_v49 = vmul.f32 %v245_v47, %v151_v32 }
 0x22c   :  { %v212_v50 = vpack.c.bf16 %v184_v48, %v184_v48  ;;  %v176_v51 = vmul.f32 %v208_v43, %v167_v49 }
 0x22e   :  { %195 = vst.msk [vmem:[%s331_s6] sm:$0xf] %vm194_vm2, %v212_v50  ;;  %v185_v52 = vadd.f32 %v209_v45, %v176_v51 }
 0x230   :  { %v213_v53 = vpack.c.bf16 %v185_v52, %v185_v52 }
 0x232   :  { %196 = vst.msk [vmem:[%s331_s6 + $0x4] sm:$0xf] %vm194_vm2, %v213_v53 }

// kernel: torch_bert_forward.18
= control target key start
LH: loop header
LB: loop body
LE: loop exit
PB: predicated region body
PF: predicated region fallthrough
CT: control target
= control target key end

     0   :  { %v201_v0 = vmov 0.0   ;;  %vm202_vm0 = vmmov 0   ;;  %vm62_vm1 = vcmask 523264   ;;  %s244_s1 = inlined_call_operand.vmem [shape: bf16[64,128], index: 1, kind: input, shape index: {}]   ;;  %s245_s0 = inlined_call_operand.vmem [shape: bf16[16,64], index: 0, kind: input, shape index: {}]   ;;  %s246_s2 = inlined_call_operand.vmem [shape: f32[1,128], index: 2, kind: input, shape index: {}]   ;;  %s247_s3 = inlined_call_operand.vmem [shape: bf16[16,128], index: 3, kind: output, shape index: {}]  }
   0x1   :  { %178 = vmatprep.subr.bf16.mxu0 %v201_v0  ;;  %v192_v1 = vld [vmem:[%s244_s1] sm:$0xff]   ;;  %186 = vmatprep.mubr.msk.bf16.mxu0 %vm202_vm0, %v201_v0  ;;  %v193_v2 = vld [vmem:[%s244_s1 + $0x8] sm:$0xff]   ;;  %v194_v3 = vld [vmem:[%s244_s1 + $0x10] sm:$0xff]  }
   0x2   :  { %179 = vmatpush3.bf16.msra.mxu0 %v192_v1  ;;  %v195_v4 = vld [vmem:[%s244_s1 + $0x18] sm:$0xff]   ;;  %v196_v5 = vld [vmem:[%s245_s0] sm:$0xff]  }
   0x3   :  { %180 = vmatprep.subr.bf16.mxu0 %v201_v0  ;;  %v163_v6 = vld [vmem:[%s246_s2] ss:$0 sm:$0xff] }
   0x6   :  { %181 = vmatpush3.bf16.msra.mxu0 %v193_v2 }
   0x7   :  { %182 = vmatprep.subr.bf16.mxu0 %v201_v0 }
   0xa   :  { %183 = vmatpush3.bf16.msra.mxu0 %v194_v3 }
   0xb   :  { %184 = vmatprep.subr.bf16.mxu0 %v201_v0 }
   0xe   :  { %185 = vmatpush3.bf16.msra.mxu0 %v195_v4 }
  0x11   :  { %187 = vmatmul.mubr.msk.bf16.vlgmr.msra.gmra.mrb[0].mxu0 %vm62_vm1, %v196_v5 }
  0xe4   :  { %v100_v7 = vpop.f32.mrb[0].mxu0 }
  0xe5   :  { %v123_v8 = vadd.f32 %v163_v6, %v100_v7  ;;  %v188_v9 = vpop.f32.mrb[1].mxu0 }
  0xe6   :  { %v103_v10 = vpop.f32.mrb[2].mxu0 }
  0xe7   :  { %v125_v11 = vmul.f32 %v123_v8, %v123_v8  ;;  %v124_v12 = vadd.f32 %v163_v6, %v103_v10  ;;  %v189_v13 = vpop.f32.mrb[3].mxu0 }
  0xe9   :  { %v127_v14 = vmul.f32 %v125_v11, %v123_v8  ;;  %v126_v15 = vmul.f32 %v124_v12, %v124_v12 }
  0xeb   :  { %v129_v16 = vmul.f32 0.044715, %v127_v14  ;;  %v128_v17 = vmul.f32 %v126_v15, %v124_v12 }
  0xed   :  { %v131_v18 = vadd.f32 %v129_v16, %v123_v8  ;;  %v130_v19 = vmul.f32 0.044715, %v128_v17 }
  0xef   :  { %v133_v20 = vmul.f32 0.7978846, %v131_v18  ;;  %v132_v21 = vadd.f32 %v130_v19, %v124_v12 }
  0xf1   :  { %197 = vtanh.f32 %v133_v20  ;;  %v134_v22 = vmul.f32 0.7978846, %v132_v21 }
  0xf3   :  { %199 = vtanh.f32 %v134_v22 }
  0xfb   :  { %v198_v23 = vpop.eup %197 }
  0xfc   :  { %v137_v24 = vadd.f32 1.0, %v198_v23 }
  0xfd   :  { %v200_v25 = vpop.eup %199 }
  0xfe   :  { %v139_v26 = vmul.f32 0.5, %v137_v24  ;;  %v138_v27 = vadd.f32 1.0, %v200_v25 }
 0x100   :  { %v140_v28 = vmul.f32 0.5, %v138_v27  ;;  %v141_v29 = vmul.f32 %v139_v26, %v123_v8 }
 0x102   :  { %v142_v30 = vmul.f32 %v140_v28, %v124_v12 }
 0x104   :  { %v171_v31 = vpack.c.bf16 %v142_v30, %v141_v29 }
 0x106   :  { %172 = vst [vmem:[%s247_s3] sm:$0xff] %v171_v31  }

// kernel: torch_bert_forward.19
= control target key start
LH: loop header
LB: loop body
LE: loop exit
PB: predicated region body
PF: predicated region fallthrough
CT: control target
= control target key end

     0   :  { %vm28_vm0 = vcmask 523264   ;;  %v295_v0 = vmov 0.0   ;;  %vm296_vm1 = vmmov 0   ;;  %vm224_vm2 = vcmask 519168   ;;  %s385_s1 = inlined_call_operand.vmem [shape: bf16[128,64], index: 1, kind: input, shape index: {}]   ;;  %s386_s0 = inlined_call_operand.vmem [shape: bf16[16,128], index: 0, kind: input, shape index: {}]   ;;  %s387_s3 = inlined_call_operand.vmem [shape: bf16[16,64], index: 3, kind: input, shape index: {}]   ;;  %s388_s2 = inlined_call_operand.vmem [shape: f32[1,64], index: 2, kind: input, shape index: {}]   ;;  %s389_s4 = inlined_call_operand.vmem [shape: f32[1,64], index: 4, kind: input, shape index: {}]   ;;  %s390_s5 = inlined_call_operand.vmem [shape: f32[1,64], index: 5, kind: input, shape index: {}]   ;;  %s391_s6 = inlined_call_operand.vmem [shape: bf16[16,64], index: 6, kind: output, shape index: {}]  }
   0x1   :  { %260 = vmatprep.subr.bf16.mxu0 %v295_v0  ;;  %v282_v1 = vld [vmem:[%s385_s1] sm:$0xff]   ;;  %276 = vmatprep.mubr.msk.bf16.mxu0 %vm296_vm1, %v295_v0  ;;  %29 = vst.msk [vmem:[#allocation2] sm:$0xff] %vm28_vm0, %v295_v0  ;;  %30 = vst.msk [vmem:[#allocation2 + $0x8] sm:$0xff] %vm28_vm0, %v295_v0  ;;  %v283_v2 = vld [vmem:[%s385_s1 + $0x8] sm:$0xff]  }
   0x2   :  { %261 = vmatpush3.bf16.msra.mxu0 %v282_v1  ;;  %v284_v3 = vld [vmem:[%s385_s1 + $0x10] sm:$0xff]   ;;  %v285_v4 = vld [vmem:[%s385_s1 + $0x18] sm:$0xff]   ;;  %v286_v5 = vld [vmem:[%s385_s1 + $0x20] sm:$0xff]  }
   0x3   :  { %262 = vmatprep.subr.bf16.mxu0 %v295_v0  ;;  %v287_v6 = vld [vmem:[%s385_s1 + $0x28] sm:$0xff]   ;;  %v288_v7 = vld [vmem:[%s385_s1 + $0x30] sm:$0xff]   ;;  %v289_v8 = vld [vmem:[%s385_s1 + $0x38] sm:$0xff]  }
   0x4   :  { %v290_v9 = vld [vmem:[%s386_s0] sm:$0xff]  }
   0x5   :  { %v248_v18 = vld [vmem:[%s387_s3] sm:$0xff]  }
   0x6   :  { %263 = vmatpush3.bf16.msra.mxu0 %v283_v2  ;;  %v240_v19 = vld [vmem:[%s388_s2] ss:$0 sm:$0xff]  ;;  %v249_v20 = vunpack.c.l.bf16 %v248_v18  ;;  %v250_v23 = vunpack.c.h.bf16 %v248_v18 }
   0x7   :  { %264 = vmatprep.subr.bf16.mxu0 %v295_v0  ;;  %v241_v47 = vld [vmem:[%s389_s4] ss:$0 sm:$0xff] }
   0x8   :  { %v31_v10 = vld [vmem:[#allocation2] sm:$0xff]  ;;  %v32_v12 = vld [vmem:[#allocation2 + $0x8] sm:$0xff] }
   0x9   :  { %v242_v49 = vld [vmem:[%s390_s5] ss:$0 sm:$0xff] }
   0xa   :  { %265 = vmatpush3.bf16.msra.mxu0 %v284_v3 }
   0xb   :  { %266 = vmatprep.subr.bf16.mxu0 %v295_v0 }
   0xe   :  { %267 = vmatpush3.bf16.msra.mxu0 %v285_v4 }
   0xf   :  { %268 = vmatprep.subr.bf16.mxu0 %v295_v0 }
  0x12   :  { %269 = vmatpush3.bf16.msra.mxu0 %v286_v5 }
  0x13   :  { %270 = vmatprep.subr.bf16.mxu0 %v295_v0 }
  0x16   :  { %271 = vmatpush3.bf16.msra.mxu0 %v287_v6 }
  0x17   :  { %272 = vmatprep.subr.bf16.mxu0 %v295_v0 }
  0x1a   :  { %273 = vmatpush3.bf16.msra.mxu0 %v288_v7 }
  0x1b   :  { %274 = vmatprep.subr.bf16.mxu0 %v295_v0 }
  0x1e   :  { %275 = vmatpush3.bf16.msra.mxu0 %v289_v8 }
  0x21   :  { %277 = vmatmul.mubr.bf16.vlgmr.msra.gmra.mrb[0].mxu0 %v290_v9 }
  0xf4   :  { %v139_v11 = vpop.f32.mrb[0].mxu0 }
  0xf5   :  { %v146_v13 = vadd.f32 %v139_v11, %v31_v10  ;;  %v278_v14 = vpop.f32.mrb[1].mxu0 }
  0xf6   :  { %v142_v15 = vpop.f32.mrb[2].mxu0 }
  0xf7   :  { %149 = vst.msk [vmem:[#allocation2] sm:$0xff] %vm28_vm0, %v146_v13  ;;  %v147_v16 = vadd.f32 %v142_v15, %v32_v12  ;;  %v279_v17 = vpop.f32.mrb[3].mxu0 }
  0xf9   :  { %150 = vst.msk [vmem:[#allocation2 + $0x8] sm:$0xff] %vm28_vm0, %v147_v16 }
  0xfe   :  { %v154_v21 = vld [vmem:[#allocation2] sm:$0xff] }
  0xff   :  { %v163_v22 = vadd.f32 %v240_v19, %v154_v21 }
 0x100   :  { %v155_v24 = vld [vmem:[#allocation2 + $0x8] sm:$0xff] }
 0x101   :  { %v169_v25 = vadd.f32 %v249_v20, %v163_v22  ;;  %v164_v26 = vadd.f32 %v240_v19, %v155_v24 }
 0x103   :  { %v171_v27 = vsel %vm28_vm0, %v169_v25, 0.0  ;;  %v170_v28 = vadd.f32 %v250_v23, %v164_v26 }
 0x104   :  { %172 = vadd.xlane.f32.xlu0 %v171_v27 }
 0x105   :  { %v174_v29 = vsel %vm28_vm0, %v170_v28, 0.0 }
 0x108   :  { %175 = vadd.xlane.f32.xlu0 %v174_v29 }
 0x191   :  { %v173_v30 = vpop.xlane.xlu0 %172 }
 0x192   :  { %v178_v31 = vmul.f32 0.015625, %v173_v30 }
 0x194   :  { %v180_v32 = vsub.f32 %v169_v25, %v178_v31 }
 0x195   :  { %v176_v33 = vpop.xlane.xlu0 %175 }
 0x196   :  { %v179_v34 = vmul.f32 0.015625, %v176_v33  ;;  %v182_v35 = vmul.f32 %v180_v32, %v180_v32 }
 0x198   :  { %v181_v36 = vsub.f32 %v170_v28, %v179_v34  ;;  %v184_v37 = vsel %vm28_vm0, %v182_v35, 0.0 }
 0x199   :  { %185 = vadd.xlane.f32.xlu1 %v184_v37 }
 0x19a   :  { %v183_v38 = vmul.f32 %v181_v36, %v181_v36 }
 0x19c   :  { %v187_v39 = vsel %vm28_vm0, %v183_v38, 0.0 }
 0x19d   :  { %188 = vadd.xlane.f32.xlu1 %v187_v39 }
 0x226   :  { %v186_v40 = vpop.xlane.xlu1 %185 }
 0x227   :  { %v190_v41 = vmul.f32 0.015625, %v186_v40 }
 0x229   :  { %v192_v42 = vadd.f32 1e-12, %v190_v41 }
 0x22a   :  { %v189_v43 = vpop.xlane.xlu1 %188 }
 0x22b   :  { %291 = vrsqrt.f32 %v192_v42  ;;  %v191_v44 = vmul.f32 0.015625, %v189_v43 }
 0x22d   :  { %v193_v45 = vadd.f32 1e-12, %v191_v44 }
 0x22f   :  { %293 = vrsqrt.f32 %v193_v45 }
 0x235   :  { %v292_v46 = vpop.eup %291 }
 0x236   :  { %v196_v48 = vmul.f32 %v292_v46, %v180_v32 }
 0x238   :  { %v205_v50 = vmul.f32 %v241_v47, %v196_v48 }
 0x239   :  { %v294_v51 = vpop.eup %293 }
 0x23a   :  { %v214_v52 = vadd.f32 %v242_v49, %v205_v50  ;;  %v197_v53 = vmul.f32 %v294_v51, %v181_v36 }
 0x23c   :  { %v245_v54 = vpack.c.bf16 %v214_v52, %v214_v52  ;;  %v206_v55 = vmul.f32 %v241_v47, %v197_v53 }
 0x23e   :  { %225 = vst.msk [vmem:[%s391_s6] sm:$0xf] %vm224_vm2, %v245_v54  ;;  %v215_v56 = vadd.f32 %v242_v49, %v206_v55 }
 0x240   :  { %v246_v57 = vpack.c.bf16 %v215_v56, %v215_v56 }
 0x242   :  { %226 = vst.msk [vmem:[%s391_s6 + $0x4] sm:$0xf] %vm224_vm2, %v246_v57 }

// kernel: torch_bert_forward.26
= control target key start
LH: loop header
LB: loop body
LE: loop exit
PB: predicated region body
PF: predicated region fallthrough
CT: control target
= control target key end

     0   :  { %vm25_vm0 = vcmask 523264   ;;  %v190_v0 = vmov 0.0   ;;  %vm191_vm1 = vmmov 0   ;;  %vm151_vm2 = vcmask 519168   ;;  %s254_s1 = inlined_call_operand.vmem [shape: bf16[64,64], index: 1, kind: input, shape index: {}]   ;;  %s255_s0 = inlined_call_operand.vmem [shape: bf16[8,64], index: 0, kind: input, shape index: {}]   ;;  %s256_s2 = inlined_call_operand.vmem [shape: f32[1,64], index: 2, kind: input, shape index: {}]   ;;  %s257_s3 = inlined_call_operand.vmem [shape: f32[1,64], index: 3, kind: input, shape index: {}]   ;;  %s258_s4 = inlined_call_operand.vmem [shape: f32[1,64], index: 4, kind: input, shape index: {}]   ;;  %s259_s5 = inlined_call_operand.vmem [shape: bf16[8,64], index: 5, kind: output, shape index: {}]  }
   0x1   :  { %170 = vmatprep.subr.bf16.mxu0 %v190_v0  ;;  %v184_v1 = vld [vmem:[%s254_s1] sm:$0xff]   ;;  %178 = vmatprep.mubr.msk.bf16.mxu0 %vm191_vm1, %v190_v0  ;;  %26 = vst.msk [vmem:[#allocation2] sm:$0xff] %vm25_vm0, %v190_v0  ;;  %v185_v2 = vld [vmem:[%s254_s1 + $0x8] sm:$0xff]   ;;  %v186_v3 = vld [vmem:[%s254_s1 + $0x10] sm:$0xff]  }
   0x2   :  { %171 = vmatpush3.bf16.msra.mxu0 %v184_v1  ;;  %v187_v4 = vld [vmem:[%s254_s1 + $0x18] sm:$0xff]   ;;  %v28_v5 = vld [vmem:[%s255_s0] sm:$0xf] }
   0x3   :  { %172 = vmatprep.subr.bf16.mxu0 %v190_v0  ;;  %v162_v12 = vld [vmem:[%s256_s2] ss:$0 sm:$0xff] }
   0x4   :  { %v163_v26 = vld [vmem:[%s257_s3] ss:$0 sm:$0xff] }
   0x5   :  { %v164_v28 = vld [vmem:[%s258_s4] ss:$0 sm:$0xff] }
   0x6   :  { %173 = vmatpush3.bf16.msra.mxu0 %v185_v2 }
   0x7   :  { %174 = vmatprep.subr.bf16.mxu0 %v190_v0 }
   0x8   :  { %v27_v6 = vld [vmem:[#allocation2] sm:$0xff] }
   0xa   :  { %175 = vmatpush3.bf16.msra.mxu0 %v186_v3 }
   0xb   :  { %176 = vmatprep.subr.bf16.mxu0 %v190_v0 }
   0xe   :  { %177 = vmatpush3.bf16.msra.mxu0 %v187_v4 }
  0x11   :  { %179 = vmatmul.mubr.msk.bf16.vlgmr.msra.gmra.mrb[0].mxu0 %vm25_vm0, %v28_v5 }
  0xe4   :  { %v99_v7 = vpop.f32.mrb[0].mxu0 }
  0xe5   :  { %v105_v8 = vadd.f32 %v99_v7, %v27_v6  ;;  %v180_v9 = vpop.f32.mrb[1].mxu0 }
  0xe6   :  { %v102_v10 = vpop.f32.mrb[2].mxu0 }
  0xe7   :  { %106 = vst.msk [vmem:[#allocation2] sm:$0xff] %vm25_vm0, %v105_v8  ;;  %v181_v11 = vpop.f32.mrb[3].mxu0 }
  0xee   :  { %v110_v13 = vld [vmem:[#allocation2] sm:$0xff] }
  0xef   :  { %v118_v14 = vadd.f32 %v162_v12, %v110_v13 }
  0xf1   :  { %v119_v15 = vmax.f32 %v118_v14, 0.0 }
  0xf3   :  { %v120_v16 = vsel %vm25_vm0, %v119_v15, 0.0 }
  0xf4   :  { %121 = vadd.xlane.f32.xlu0 %v120_v16 }
 0x181   :  { %v122_v17 = vpop.xlane.xlu0 %121 }
 0x182   :  { %v124_v18 = vmul.f32 0.015625, %v122_v17 }
 0x184   :  { %v125_v19 = vsub.f32 %v119_v15, %v124_v18 }
 0x186   :  { %v126_v20 = vmul.f32 %v125_v19, %v125_v19 }
 0x188   :  { %v127_v21 = vsel %vm25_vm0, %v126_v20, 0.0 }
 0x189   :  { %128 = vadd.xlane.f32.xlu0 %v127_v21 }
 0x216   :  { %v129_v22 = vpop.xlane.xlu0 %128 }
 0x217   :  { %v130_v23 = vmul.f32 0.015625, %v129_v22 }
 0x219   :  { %v131_v24 = vadd.f32 1e-12, %v130_v23 }
 0x21b   :  { %188 = vrsqrt.f32 %v131_v24 }
 0x225   :  { %v189_v25 = vpop.eup %188 }
 0x226   :  { %v133_v27 = vmul.f32 %v189_v25, %v125_v19 }
 0x228   :  { %v141_v29 = vmul.f32 %v163_v26, %v133_v27 }
 0x22a   :  { %v149_v30 = vadd.f32 %v164_v28, %v141_v29 }
 0x22c   :  { %v150_v31 = vpack.c.bf16 %v149_v30, %v149_v30 }
 0x22e   :  { %152 = vst.msk [vmem:[%s259_s5] sm:$0xf] %vm151_vm2, %v150_v31 }

// kernel: torch_bert_forward.27
= control target key start
LH: loop header
LB: loop body
LE: loop exit
PB: predicated region body
PF: predicated region fallthrough
CT: control target
= control target key end

     0   :  { %s1007_s12 = smov 0   ;;  %s1009_s13 = smov 0   ;;  %s1155_s0 = inlined_call_operand.vmem [shape: bf16[8,64], index: 0, kind: input, shape index: {}]   ;;  %s1156_s1 = inlined_call_operand.vmem [shape: bf16[64,1280], index: 1, kind: input, shape index: {}]   ;;  %s1157_s2 = inlined_call_operand.vmem [shape: f32[1,1280], index: 2, kind: input, shape index: {}]   ;;  %s1158_s3 = inlined_call_operand.vmem [shape: bf16[8,1280], index: 3, kind: output, shape index: {}]  }
   0x1   :  { %s1011_s14 = smov 0   ;;  %s1013_s15 = smov 0  }
   0x2   :  { %s1015_s16 = smov 0  }
   0x3 LB: > { %s28_s17 = sadd.s32 1, %s978_s15  ;;  %p76_p1 = scmp.ne.s32.totalorder %s970_s13, %s966_s12  ;;  %s982_s16 = sphi %s1015_s16, %s13_s16   ;;  %s978_s15 = sphi %s1013_s15, %s1162_s15   ;;  %s974_s14 = sphi %s1011_s14, %s1161_s14   ;;  %s970_s13 = sphi %s1009_s13, %s1160_s13   ;;  %s966_s12 = sphi %s1007_s12, %s1159_s12  }
   0x4   : > { %p30_p0 = scmp.ge.s32.totalorder %s28_s17, 2  ;;  %p77_p2 = scmp.eq.s32.totalorder %s982_s16, 0 }
   0x5   : > { %s69_s19 = sadd.s32 1, %s970_s13  ;;  %p802_p5 = scmp.ge.s32.totalorder %s982_s16, 2 }
   0x6   : > { %s1164_s17 = smov (%p30_p0, %s28_s17), 0  ;;  %p78_p3 = por %p77_p2, %p76_p1 }
   0x7   : > { %s65_s18 = ssub.s32 %s978_s15, %s1164_s17  ;;  %166 = sbr.rel (%p802_p5) target bundleno = 32 (0x20), region = 20 }
   0x8   : > { %p67_p4 = scmp.eq.s32.totalorder %s65_s18, 0 }
   0xa   : > { %s1042_s20 = scalar_select %p67_p4, %s970_s13, %s69_s19  }
   0xe   : > { %169 = sbr.rel (!%p78_p3) target bundleno = 32 (0x20), region = 24  ;;  %s171_s21 = sand.u32 (%p78_p3), 1, %s970_s13  }
   0xf   : > { %s850_s22 = smul.u32 (%p78_p3), 20, %s978_s15 }
  0x10   : > { %s871_s23 = smul.u32 (%p78_p3), 160, %s171_s21 }
  0x11   : > { %s1050_s26 = scalar_lea.vmem (%p78_p3), %s1156_s1, %s850_s22 }
  0x12   : > { %v194_v0 = vld [vmem:[%s1050_s26] sm:$0xff] (%p78_p3)  ;;  %v196_v1 = vld [vmem:[%s1050_s26 + $0x8] sm:$0xff] (%p78_p3)  ;;  %s1055_s27 = scalar_lea.vmem (%p78_p3), [#allocation3], %s871_s23  ;;  %v200_v3 = vld [vmem:[%s1050_s26 + $0x30] sm:$0xff] (%p78_p3) }
  0x13   : > { %v198_v2 = vld [vmem:[%s1050_s26 + $0x28] sm:$0xff] (%p78_p3)  ;;  %195 = vst [vmem:[%s1055_s27] sm:$0xff] (%p78_p3), %v194_v0  ;;  %197 = vst [vmem:[%s1055_s27 + $0x8] sm:$0xff] (%p78_p3), %v196_v1  ;;  %v202_v4 = vld [vmem:[%s1050_s26 + $0x50] sm:$0xff] (%p78_p3) }
  0x14   : > { %199 = vst [vmem:[%s1055_s27 + $0x14] sm:$0xff] (%p78_p3), %v198_v2  ;;  %v204_v5 = vld [vmem:[%s1050_s26 + $0x58] sm:$0xff] (%p78_p3)  ;;  %201 = vst [vmem:[%s1055_s27 + $0x1c] sm:$0xff] (%p78_p3), %v200_v3  ;;  %v208_v7 = vld [vmem:[%s1050_s26 + $0x80] sm:$0xff] (%p78_p3) }
  0x15   : > { %203 = vst [vmem:[%s1055_s27 + $0x28] sm:$0xff] %v202_v4  ;;  %205 = vst [vmem:[%s1055_s27 + $0x30] sm:$0xff] %v204_v5  ;;  %v206_v6 = vld [vmem:[%s1050_s26 + $0x78] sm:$0xff]  ;;  %v210_v8 = vld [vmem:[%s1050_s26 + $0xa0] sm:$0xff] }
  0x16   : > { %207 = vst [vmem:[%s1055_s27 + $0x3c] sm:$0xff] %v206_v6  ;;  %209 = vst [vmem:[%s1055_s27 + $0x44] sm:$0xff] %v208_v7  ;;  %v212_v9 = vld [vmem:[%s1050_s26 + $0xa8] sm:$0xff]  ;;  %v216_v11 = vld [vmem:[%s1050_s26 + $0xd0] sm:$0xff] }
  0x17   : > { %211 = vst [vmem:[%s1055_s27 + $0x50] sm:$0xff] %v210_v8  ;;  %v214_v10 = vld [vmem:[%s1050_s26 + $0xc8] sm:$0xff]  ;;  %213 = vst [vmem:[%s1055_s27 + $0x58] sm:$0xff] %v212_v9  ;;  %v218_v12 = vld [vmem:[%s1050_s26 + $0xf0] sm:$0xff] }
  0x18   : > { %215 = vst [vmem:[%s1055_s27 + $0x64] sm:$0xff] %v214_v10  ;;  %217 = vst [vmem:[%s1055_s27 + $0x6c] sm:$0xff] %v216_v11  ;;  %v220_v13 = vld [vmem:[%s1050_s26 + $0xf8] sm:$0xff]  ;;  %v224_v15 = vld [vmem:[%s1050_s26 + $0x120] sm:$0xff] }
  0x19   : > { %v222_v14 = vld [vmem:[%s1050_s26 + $0x118] sm:$0xff]  ;;  %219 = vst [vmem:[%s1055_s27 + $0x78] sm:$0xff] %v218_v12  ;;  %221 = vst [vmem:[%s1055_s27 + $0x80] sm:$0xff] %v220_v13  ;;  %v804_v16 = vld [vmem:[%s1050_s26 + $0x10] sm:$0xf] }
  0x1a   : > { %223 = vst [vmem:[%s1055_s27 + $0x8c] sm:$0xff] %v222_v14  ;;  %v806_v17 = vld [vmem:[%s1050_s26 + $0x38] sm:$0xf]  ;;  %225 = vst [vmem:[%s1055_s27 + $0x94] sm:$0xff] %v224_v15  ;;  %v808_v18 = vld [vmem:[%s1050_s26 + $0x60] sm:$0xf] }
  0x1b   : > { %805 = vst [vmem:[%s1055_s27 + $0x10] sm:$0xf] %v804_v16  ;;  %807 = vst [vmem:[%s1055_s27 + $0x24] sm:$0xf] %v806_v17  ;;  %v810_v19 = vld [vmem:[%s1050_s26 + $0x88] sm:$0xf] }
  0x1c   : > { %v812_v20 = vld [vmem:[%s1050_s26 + $0xb0] sm:$0xf]  ;;  %809 = vst [vmem:[%s1055_s27 + $0x38] sm:$0xf] %v808_v18  ;;  %811 = vst [vmem:[%s1055_s27 + $0x4c] sm:$0xf] %v810_v19 }
  0x1d   : > { %813 = vst [vmem:[%s1055_s27 + $0x60] sm:$0xf] %v812_v20  ;;  %v814_v21 = vld [vmem:[%s1050_s26 + $0xd8] sm:$0xf]  ;;  %v816_v22 = vld [vmem:[%s1050_s26 + $0x100] sm:$0xf] }
  0x1e   : > { %v818_v23 = vld [vmem:[%s1050_s26 + $0x128] sm:$0xf]  ;;  %815 = vst [vmem:[%s1055_s27 + $0x74] sm:$0xf] %v814_v21  ;;  %817 = vst [vmem:[%s1055_s27 + $0x88] sm:$0xf] %v816_v22 }
  0x1f   : > { %819 = vst [vmem:[%s1055_s27 + $0x9c] sm:$0xf] %v818_v23 }
  0x20 PF: > { %p820_p6 = scmp.ge.s32.totalorder %s982_s16, 1  ;;  %p261_p7 = scmp.lt.s32.totalorder %s982_s16, 3 }
  0x22   : > { %p262_p8 = pnand %p820_p6, %p261_p7 }
  0x23   : > { %s268_s28 = sand.u32 (!%p262_p8), 1, %s966_s12   ;;  %v984_v24 = vmov (!%p262_p8), 0   ;;  %v345_v40 = vld [vmem:[%s1155_s0] sm:$0xf] (!%p262_p8)  ;;  %vm474_vm0 = vcmask (!%p262_p8), 523264   ;;  %v985_v42 = vmov (!%p262_p8), 0.0   ;;  %v620_v47 = vlaneseq (!%p262_p8) }
  0x24   : > { %265 = sbr.rel (%p262_p8) target bundleno = 290 (0x122), region = 54  ;;  %510 = vmatprep.mubr.bf16.mxu0 (!%p262_p8), %v984_v24  ;;  %551 = vmatprep.mubr.bf16.mxu1 (!%p262_p8), %v984_v24  ;;  %vm986_vm1 = vmmov (!%p262_p8), 0  }
  0x25   : > { %s872_s29 = smul.u32 (!%p262_p8), 160, %s268_s28  ;;  %v621_v48 = vshrl.u32 (!%p262_p8), %v620_v47, 7 }
  0x26   : > { %s315_s6 = smul.u32 (!%p262_p8), 5, %s974_s14 }
  0x27   : > { %s1105_s30 = scalar_lea.vmem (!%p262_p8), [#allocation3], %s872_s29  ;;  %v622_v49 = vsub.s32 (!%p262_p8), 0, %v621_v48  ;;  %v626_v51 = vsub.s32 (!%p262_p8), 1, %v621_v48  ;;  %v630_v54 = vsub.s32 (!%p262_p8), 2, %v621_v48  ;;  %v634_v55 = vsub.s32 (!%p262_p8), 3, %v621_v48 }
  0x28   : > { %v916_v25 = vld [vmem:[%s1105_s30 + $0x4] ss:$20 sps:$4 sm:$0xff] (!%p262_p8)   ;;  %v918_v26 = vld [vmem:[%s1105_s30] ss:$20 sps:$4 sm:$0xff] (!%p262_p8)   ;;  %v921_v28 = vld [vmem:[%s1105_s30 + $0x28] ss:$20 sps:$4 sm:$0xff] (!%p262_p8)  }
  0x29   : > { %478 = vmatprep.subr.bf16.mxu0 (!%p262_p8), %v916_v25  ;;  %v919_v27 = vld [vmem:[%s1105_s30 + $0x2c] ss:$20 sps:$4 sm:$0xff] (!%p262_p8)   ;;  %v922_v29 = vld [vmem:[%s1105_s30 + $0x54] ss:$20 sps:$4 sm:$0xff] (!%p262_p8)   ;;  %v924_v31 = vld [vmem:[%s1105_s30 + $0x50] ss:$20 sps:$4 sm:$0xff] (!%p262_p8)  }
  0x2a   : > { %479 = vmatpush1.bf16.msra.mxu0 (!%p262_p8), %v918_v26  ;;  %v927_v30 = vld [vmem:[%s1105_s30 + $0xc] ss:$20 sps:$4 sm:$0xff] (!%p262_p8)   ;;  %v930_v32 = vld [vmem:[%s1105_s30 + $0x8] ss:$20 sps:$4 sm:$0xff] (!%p262_p8)   ;;  %v933_v35 = vld [vmem:[%s1105_s30 + $0x30] ss:$20 sps:$4 sm:$0xff] (!%p262_p8)  }
  0x2b   : > { %480 = vmatprep.subr.bf16.mxu0 %v919_v27  ;;  %v925_v33 = vld [vmem:[%s1105_s30 + $0x7c] ss:$20 sps:$4 sm:$0xff]   ;;  %519 = vmatprep.subr.bf16.mxu1 %v927_v30  ;;  %v931_v34 = vld [vmem:[%s1105_s30 + $0x34] ss:$20 sps:$4 sm:$0xff]   ;;  %v929_v37 = vld [vmem:[%s1105_s30 + $0x78] ss:$20 sps:$4 sm:$0xff]  }
  0x2c   : > { %520 = vmatpush1.bf16.msra.mxu1 %v930_v32  ;;  %v935_v36 = vld [vmem:[%s1105_s30 + $0x5c] ss:$20 sps:$4 sm:$0xff]   ;;  %v937_v38 = vld [vmem:[%s1105_s30 + $0x58] ss:$20 sps:$4 sm:$0xff]   ;;  %v941_v43 = vld [vmem:[%s1105_s30 + $0x80] ss:$20 sps:$4 sm:$0xff]  }
  0x2d   : > { %521 = vmatprep.subr.bf16.mxu1 %v931_v34  ;;  %v939_v39 = vld [vmem:[%s1105_s30 + $0x84] ss:$20 sps:$4 sm:$0xff]   ;;  %v942_v45 = vld [vmem:[%s1105_s30 + $0x60] ss:$20 sps:$4 sm:$0xff]   ;;  %v943_v46 = vld [vmem:[%s1105_s30 + $0x88] ss:$20 sps:$4 sm:$0xff]  }
  0x2e   : > { %481 = vmatpush1.bf16.msra.mxu0 %v921_v28  ;;  %v934_v41 = vld [vmem:[%s1105_s30 + $0x10] ss:$20 sps:$4 sm:$0xff]   ;;  %v938_v44 = vld [vmem:[%s1105_s30 + $0x38] ss:$20 sps:$4 sm:$0xff]   ;;  %p316_p9 = scmp.lt.s32.totalorder %s315_s6, 9  ;;  %v638_v8 = vsub.s32 4, %v621_v48 }
  0x2f   : > { %482 = vmatprep.subr.bf16.mxu0 %v922_v29 }
  0x30   : > { %522 = vmatpush1.bf16.msra.mxu1 %v933_v35  ;;  %s1166_s6 = smov (!%p316_p9, %s315_s6), 9 }
  0x31   : > { %523 = vmatprep.subr.bf16.mxu1 %v935_v36  ;;  %s318_s9 = scalar_lea.vmem %s1157_s2, %s1166_s6  ;;  %s821_s10 = sshll.u32 %s1166_s6, 2 }
  0x32   : > { %483 = vmatpush1.bf16.msra.mxu0 %v924_v31  ;;  %v618_v50 = vld [vmem:[%s318_s9] sm:$0x1f]  ;;  %s328_s14 = scalar_lea.vmem %s1158_s3, %s821_s10 }
  0x33   : > { %484 = vmatprep.subr.bf16.mxu0 %v925_v33  ;;  %v623_v52 = vrot.slane %v618_v50, %v622_v49  ;;  %v627_v53 = vrot.slane %v618_v50, %v626_v51  ;;  %v631_v61 = vrot.slane %v618_v50, %v630_v54  ;;  %v635_v63 = vrot.slane %v618_v50, %v634_v55 }
  0x34   : > { %524 = vmatpush1.bf16.msra.mxu1 %v937_v38  ;;  %v639_v9 = vrot.slane %v618_v50, %v638_v8 }
  0x35   : > { %525 = vmatprep.subr.bf16.mxu1 %v939_v39 }
  0x36   : > { %485 = vmatpush1.bf16.msra.mxu0 %v929_v37 }
  0x37   : > { %859 = vmatprep.subr.bf16.mxu0 %v985_v42 }
  0x38   : > { %526 = vmatpush1.bf16.msra.mxu1 %v941_v43 }
  0x39   : > { %842 = vmatmul.mubr.msk.bf16.vlgmr.msra.gmra.mrb[0].mxu0 %vm474_vm0, %v345_v40 }
  0x3a   : > { %860 = vmatpush3.bf16.msra.mxu0 %v934_v41  ;;  %867 = vmatprep.mubr.msk.bf16.mxu0 %vm986_vm1, %v985_v42 }
  0x3b   : > { %861 = vmatprep.subr.bf16.mxu0 %v985_v42  ;;  %843 = vmatmul.mubr.msk.bf16.vlgmr.msra.gmra.mrb[0].mxu1 %vm474_vm0, %v345_v40 }
  0x3e   : > { %862 = vmatpush3.bf16.msra.mxu0 %v938_v44 }
  0x3f   : > { %863 = vmatprep.subr.bf16.mxu0 %v985_v42 }
  0x42   : > { %864 = vmatpush3.bf16.msra.mxu0 %v942_v45 }
  0x43   : > { %865 = vmatprep.subr.bf16.mxu0 %v985_v42 }
  0x46   : > { %866 = vmatpush3.bf16.msra.mxu0 %v943_v46 }
  0x49   : > { %868 = vmatmul.mubr.msk.bf16.vlgmr.msra.gmra.mrb[4].mxu0 %vm474_vm0, %v345_v40 }
 0x10c   : > { %v512_v56 = vpop.f32.mrb[0].mxu0 }
 0x10d   : > { %v645_v57 = vadd.f32 %v623_v52, %v512_v56  ;;  %v514_v58 = vpop.f32.mrb[1].mxu0 }
 0x10e   : > { %v646_v59 = vadd.f32 %v627_v53, %v514_v58  ;;  %v516_v60 = vpop.f32.mrb[2].mxu0  ;;  %v553_v1 = vpop.f32.mrb[0].mxu1 }
 0x10f   : > { %v517_v62 = vpop.f32.mrb[3].mxu0  ;;  %v647_v2 = vadd.f32 %v631_v61, %v553_v1  ;;  %v555_v3 = vpop.f32.mrb[1].mxu1 }
 0x110   : > { %v851_v0 = vpack.c.bf16 %v646_v59, %v645_v57  ;;  %v648_v4 = vadd.f32 %v635_v63, %v555_v3  ;;  %v557_v5 = vpop.f32.mrb[2].mxu1 }
 0x111   : > { %v558_v6 = vpop.f32.mrb[3].mxu1 }
 0x112   : > { %671 = vst [vmem:[%s328_s14] sm:$0xff] %v851_v0  ;;  %v852_v7 = vpack.c.bf16 %v648_v4, %v647_v2 }
 0x114   : > { %672 = vst [vmem:[%s328_s14 + $0x8] sm:$0xff] %v852_v7 }
 0x11c   : > { %v594_v10 = vpop.f32.mrb[4].mxu0 }
 0x11d   : > { %v649_v11 = vadd.f32 %v639_v9, %v594_v10  ;;  %v869_v12 = vpop.f32.mrb[5].mxu0 }
 0x11e   : > { %v597_v13 = vpop.f32.mrb[6].mxu0 }
 0x11f   : > { %v853_v14 = vpack.c.bf16 %v649_v11, %v649_v11  ;;  %v870_v15 = vpop.f32.mrb[7].mxu0 }
 0x121   : > { %673 = vst [vmem:[%s328_s14 + $0x10] sm:$0xf] %v853_v14 }
 0x122 PF: > { %s13_s16 = sadd.s32 1, %s982_s16   ;;  %s1159_s12 = smov %s970_s13 }
 0x123   : > { %p10_p10 = scmp.ge.s32.totalorder %s13_s16, 4   ;;  %s1160_s13 = smov %s1042_s20 }
 0x124   : > { %s1161_s14 = smov %s978_s15  ;;  %s1162_s15 = smov %s1164_s17 }
 0x125   :  { %12 = sbr.rel (!%p10_p10) target bundleno = 3 (0x3), region = 113 }

// kernel: torch_bert_forward.25
= control target key start
LH: loop header
LB: loop body
LE: loop exit
PB: predicated region body
PF: predicated region fallthrough
CT: control target
= control target key end

     0   :  { %14 = vsyncpa [#allocation3], 0  ;;  %v452_v1 = vmov 0.0   ;;  %vm453_vm0 = vmmov 0   ;;  %s579_s0 = inlined_call_operand.vmem [shape: bf16[2,64], index: 0, kind: input, shape index: {}]   ;;  %s580_s1 = inlined_call_operand.vmem [shape: bf16[64,64], index: 1, kind: input, shape index: {}]   ;;  %s581_s2 = inlined_call_operand.vmem [shape: f32[1,64], index: 2, kind: input, shape index: {}]   ;;  %s582_s3 = inlined_call_operand.vmem [shape: bf16[64,64], index: 3, kind: input, shape index: {}]   ;;  %s583_s4 = inlined_call_operand.vmem [shape: f32[1,64], index: 4, kind: input, shape index: {}]   ;;  %s584_s5 = inlined_call_operand.vmem [shape: bf16[64,2], index: 5, kind: input, shape index: {}]   ;;  %s585_s6 = inlined_call_operand.vmem [shape: f32[1,2], index: 6, kind: input, shape index: {}]   ;;  %s586_s7 = inlined_call_operand.hbm [shape: f32[2,64], index: 7, kind: output, shape index: {0}]   ;;  %s587_s8 = inlined_call_operand.hbm [shape: f32[2,2], index: 8, kind: output, shape index: {1}]  }
   0x1   :  { %v388_v0 = vld [vmem:[%s580_s1] sm:$0xff]   ;;  %348 = vmatprep.subr.bf16.mxu0 %v452_v1  ;;  %360 = vmatprep.subr.bf16.mxu1 %v452_v1  ;;  %v389_v2 = vld [vmem:[%s580_s1 + $0x8] sm:$0xff]   ;;  %v390_v3 = vld [vmem:[%s580_s1 + $0x10] sm:$0xff]  }
   0x2   :  { %349 = vmatpush3.bf16.msra.mxu0 %v388_v0  ;;  %356 = vmatprep.mubr.msk.bf16.mxu0 %vm453_vm0, %v452_v1  ;;  %v391_v4 = vld [vmem:[%s580_s1 + $0x18] sm:$0xff]  }
   0x3   :  { %350 = vmatprep.subr.bf16.mxu0 %v452_v1  ;;  %368 = vmatprep.mubr.msk.bf16.mxu1 %vm453_vm0, %v452_v1 }
   0x6   :  { %351 = vmatpush3.bf16.msra.mxu0 %v389_v2 }
   0x7   :  { %352 = vmatprep.subr.bf16.mxu0 %v452_v1 }
   0xa   :  { %353 = vmatpush3.bf16.msra.mxu0 %v390_v3 }
   0xb   :  { %15 = vsyncpa [#allocation5], 0  ;;  %354 = vmatprep.subr.bf16.mxu0 %v452_v1  ;;  %v31_v5 = vld [vmem:[%s579_s0] sm:$0x1]  ;;  %vm71_vm1 = vcmask 523264   ;;  %v393_v7 = vld [vmem:[%s582_s3 + $0x8] sm:$0xff]  }
   0xc   :  { %v392_v6 = vld [vmem:[%s582_s3] sm:$0xff]   ;;  %v394_v8 = vld [vmem:[%s582_s3 + $0x10] sm:$0xff]   ;;  %v395_v9 = vld [vmem:[%s582_s3 + $0x18] sm:$0xff]   ;;  %vm116_vm2 = vcmask 517120   ;;  %s454_s9 = smov [#allocation2]  }
   0xd   :  { %361 = vmatpush3.bf16.msra.mxu1 %v392_v6  ;;  %v315_v10 = vld [vmem:[%s581_s2] ss:$0 sm:$0xff]  ;;  %v397_v19 = vld [vmem:[%s584_s5 + $0x8] sm:$0xff]   ;;  %v398_v20 = vld [vmem:[%s584_s5 + $0x10] sm:$0xff]   ;;  %s293_s10 = sshll.u32 %s454_s9, 4  ;;  %s294_s10 = int_to_ptr.vmem [resolvable:$true] %s293_s10 }
   0xe   :  { %355 = vmatpush3.bf16.msra.mxu0 %v391_v4  ;;  %362 = vmatprep.subr.bf16.mxu1 %v452_v1  ;;  %v396_v18 = vld [vmem:[%s584_s5] sm:$0xff]   ;;  %v399_v21 = vld [vmem:[%s584_s5 + $0x18] sm:$0xff]   ;;  %s404_s11 = scalar_lea.vmem %s294_s10, 32  ;;  %p409_p1 = scmp.lt.s32.totalorder %s294_s10, %s294_s10 }
   0xf   :  { %372 = vmatprep.subr.bf16.mxu0 %v452_v1  ;;  %v321_v22 = vld [vmem:[%s583_s4] ss:$0 sm:$0xff]  ;;  %p405_p0 = scmp.ne.s32.totalorder %s294_s10, %s404_s11  ;;  %p410_p2 = scmp.lt.s32.totalorder %s404_s11, %s404_s11 }
  0x11   :  { %357 = vmatmul.mubr.msk.bf16.vlgmr.msra.gmra.mrb[0].mxu0 %vm71_vm1, %v31_v5  ;;  %363 = vmatpush3.bf16.msra.mxu1 %v393_v7  ;;  %p411_p3 = por %p410_p2, %p409_p1 }
  0x12   :  { %380 = vmatprep.mubr.msk.bf16.mxu0 %vm453_vm0, %v452_v1  ;;  %364 = vmatprep.subr.bf16.mxu1 %v452_v1 }
  0x13   :  { %373 = vmatpush3.bf16.msra.mxu0 %v396_v18  ;;  %p412_p4 = pnand %p411_p3, %p405_p0 }
  0x14   :  { %374 = vmatprep.subr.bf16.mxu0 %v452_v1 }
  0x15   :  { %365 = vmatpush3.bf16.msra.mxu1 %v394_v8 }
  0x16   :  { %366 = vmatprep.subr.bf16.mxu1 %v452_v1 }
  0x17   :  { %375 = vmatpush3.bf16.msra.mxu0 %v397_v19 }
  0x18   :  { %376 = vmatprep.subr.bf16.mxu0 %v452_v1 }
  0x19   :  { %367 = vmatpush3.bf16.msra.mxu1 %v395_v9 }
  0x1b   :  { %377 = vmatpush3.bf16.msra.mxu0 %v398_v20 }
  0x1c   :  { %378 = vmatprep.subr.bf16.mxu0 %v452_v1 }
  0x1f   :  { %379 = vmatpush3.bf16.msra.mxu0 %v399_v21 }
  0xe4   :  { %v109_v11 = vpop.f32.mrb[0].mxu0 }
  0xe5   :  { %v110_v12 = vadd.f32 %v315_v10, %v109_v11  ;;  %v358_v13 = vpop.f32.mrb[1].mxu0 }
  0xe6   :  { %v112_v14 = vpop.f32.mrb[2].mxu0 }
  0xe7   :  { %400 = vtanh.f32 %v110_v12  ;;  %v359_v15 = vpop.f32.mrb[3].mxu0 }
  0xf1   :  { %v401_v16 = vpop.eup %400 }
  0xf2   :  { %v118_v17 = vpack.c.bf16 %v401_v16, %v401_v16  ;;  %117 = vst.msk [vmem:[#allocation2] sm:$0x3] %vm116_vm2, %v401_v16 }
  0xf4   :  { %369 = vmatmul.mubr.msk.bf16.vlgmr.msra.gmra.mrb[0].mxu1 %vm71_vm1, %v118_v17 }
 0x1c7   :  { %v195_v23 = vpop.f32.mrb[0].mxu1 }
 0x1c8   :  { %v196_v24 = vadd.f32 %v321_v22, %v195_v23  ;;  %v370_v25 = vpop.f32.mrb[1].mxu1 }
 0x1c9   :  { %v198_v26 = vpop.f32.mrb[2].mxu1 }
 0x1ca   :  { %402 = vtanh.f32 %v196_v24  ;;  %v371_v27 = vpop.f32.mrb[3].mxu1 }
 0x1d4   :  { %v403_v28 = vpop.eup %402 }
 0x1d5   :  { %v202_v29 = vpack.c.bf16 %v403_v28, %v403_v28 }
 0x1d7   :  { %381 = vmatmul.mubr.msk.bf16.vlgmr.msra.gmra.mrb[4].mxu0 %vm71_vm1, %v202_v29 }
 0x1d8   :  { %415 = shalt.err (!%p412_p4)
}
 0x1d9   :  { %s416_s12 = scalar_lea.hbm %s586_s7, 32 }
 0x1da   :  { %p417_p5 = scmp.ne.s32.totalorder %s586_s7, %s416_s12  ;;  %p420_p6 = scmp.lt.u32.totalorder %s416_s12, %s586_s7 }
 0x1dc   :  { %p422_p7 = pnand %p420_p6, %p417_p5 }
 0x1de   :  { %425 = shalt.err (!%p422_p7)
}
 0x1df   :  { %296 = dma.vmem_to_hbm [thread:$0]  %s294_s10, 32, %s586_s7, [#allocation3]   ;;  %v327_v30 = vld [vmem:[%s585_s6] ss:$0 sm:$0xff]  ;;  %vm285_vm3 = vcmask 9216  }
 0x1e0   :  { %s455_s0 = smov [#allocation4]  }
 0x1e1   :  { %s303_s20 = sshll.u32 %s455_s0, 4  ;;  %s304_s20 = int_to_ptr.vmem [resolvable:$true] %s303_s20 }
 0x1e2   :  { %s426_s21 = scalar_lea.vmem %s304_s20, 32  ;;  %p431_p9 = scmp.lt.s32.totalorder %s304_s20, %s304_s20 }
 0x1e3   :  { %p427_p8 = scmp.ne.s32.totalorder %s304_s20, %s426_s21  ;;  %p432_p10 = scmp.lt.s32.totalorder %s426_s21, %s426_s21 }
 0x1e5   :  { %p433_p11 = por %p432_p10, %p431_p9 }
 0x1e7   :  { %p434_p12 = pnand %p433_p11, %p427_p8 }
 0x2aa   :  { %v279_v31 = vpop.f32.mrb[4].mxu0 }
 0x2ab   :  { %v280_v32 = vadd.f32 %v327_v30, %v279_v31  ;;  %v382_v33 = vpop.f32.mrb[5].mxu0 }
 0x2ac   :  { %v282_v34 = vpop.f32.mrb[6].mxu0 }
 0x2ad   :  { %v383_v35 = vpop.f32.mrb[7].mxu0  ;;  %286 = vst.msk [vmem:[#allocation4] sm:$0x3] %vm285_vm3, %v280_v32 }
 0x2ae   :  { %437 = shalt.err (!%p434_p12)
}
 0x2af   :  { %s438_s6 = scalar_lea.hbm %s587_s8, 32 }
 0x2b0   :  { %p439_p13 = scmp.ne.s32.totalorder %s587_s8, %s438_s6  ;;  %p442_p0 = scmp.lt.u32.totalorder %s438_s6, %s587_s8 }
 0x2b2   :  { %p444_p1 = pnand %p442_p0, %p439_p13 }
 0x2b4   :  { %447 = shalt.err (!%p444_p1)
}
 0x2b5   :  { %306 = dma.vmem_to_hbm [thread:$0]  %s304_s20, 32, %s587_s8, [#allocation5]  }
 0x2b6   :  { %448 = dma.done.wait [#allocation3], 32  }
 0x2b7   :  { %449 = vsyncadd [#allocation3], 4294967264 }
 0x2b8   :  { %450 = dma.done.wait [#allocation5], 32  }
 0x2b9   :  { %451 = vsyncadd [#allocation5], 4294967264 }
 0x2ba   :  { %313 = vsyncpa [#allocation3], 1 }
 0x2bb   :  { %314 = vsyncpa [#allocation5], 1 }

</bundles_post_ra>
